<compile_context>
chip_gen: v5e
topology: v5e:2x2
jax: 0.10.0
libtpu: 0.0.40
codegen_flags: <defaults>
</compile_context>

<pallas_src>
import functools

import jax
import jax.numpy as jnp
from jax.experimental import pallas as pl
from jax.experimental.pallas import tpu as pltpu

# ---- problem sizes (small, consistent with the module) ----------------------
B = 16           # batch
L = 16           # input_size (sequence length)
E = 32           # embedding_dims
C = 128          # channels (fixed by `view(-1, 128)` in _NgramBlock)
V = 50           # vocab_size
KS = (3, 4, 5)   # n-gram kernel heights of block1/2/3
KMAX = KS[-1]    # widest n-gram window
T_MAX = L - KS[0] + 1          # conv positions computed per sample (14)
NUM_CLASSES = 2
OUT_PAD = 128    # lane-dense output width; real logits live in lanes [:NUM_CLASSES]
TB_CAP = 256     # max batch rows per grid step (VMEM stays tiny well past this)


def textcnn_kernel(x_ref, wf_ref, bm_ref, wfc_ref, bfc_ref, out_ref):
    """Fused conv(x3) -> ReLU -> masked max-pool -> fc for one batch tile.

    x_ref   : (T_MAX, TB, KMAX*E) bf16  t-major im2col of the embedded tokens
    wf_ref  : (KMAX*E, 3*C)       bf16  fused conv weight (zero-padded taps)
    bm_ref  : (T_MAX, 1, 3*C)     f32   conv bias + (-1e9) invalid-position penalty
    wfc_ref : (3*C, OUT_PAD)      bf16  fc weight, zero-padded to 128 output lanes
    bfc_ref : (1, OUT_PAD)        f32   fc bias,   zero-padded to 128 output lanes
    out_ref : (TB, OUT_PAD)       f32   logits in lanes [:NUM_CLASSES]
    """
    t_max, tb, kf = x_ref.shape

    # Single deep, lane-dense MXU pass for all three n-gram branches.
    # tb is a sublane multiple, so merging (t_max, tb) -> rows is layout-free.
    x2d = x_ref[...].reshape(t_max * tb, kf)                          # bf16
    y = jnp.dot(x2d, wf_ref[...], preferred_element_type=jnp.float32)  # (T*TB, 3C) f32

    # Bias + static validity penalty fused into one add, then ReLU.
    y = y.reshape(t_max, tb, y.shape[-1]) + bm_ref[...]
    y = jnp.maximum(y, 0.0)

    # Global max-pool over conv positions (leading axis -> pure VPU reduction).
    f = jnp.max(y, axis=0)                                            # (TB, 3C) f32

    # TODO(synk): nn.Dropout(0.5) is identity at inference; no RNG dropout applied.
    out_ref[...] = (jnp.dot(f.astype(wfc_ref.dtype), wfc_ref[...],
                            preferred_element_type=jnp.float32)
                    + bfc_ref[...])


@jax.jit
def textcnn_forward(tokens, params):
    """tokens: (B, L) int32 ids.  Returns (B, NUM_CLASSES) f32 logits."""
    b = tokens.shape[0]

    # Embedding lookup + im2col are cheap glue fused by XLA inside this jit.
    emb = params['emb_table'][tokens]                                  # (B, L, E) f32
    emb_p = jnp.pad(emb, ((0, 0), (0, KMAX - 1), (0, 0)))              # (B, L+4, E)
    x = jnp.concatenate(
        [emb_p[:, dk:dk + T_MAX, :] for dk in range(KMAX)], axis=-1)   # (B, T_MAX, 160)
    # t-major layout so the kernel's reshapes are layout-preserving; bf16 operands.
    x = jnp.transpose(x, (1, 0, 2)).astype(jnp.bfloat16)               # (T_MAX, B, 160)

    b8 = pl.cdiv(b, 8) * 8
    tb = b8 if b8 <= TB_CAP else TB_CAP
    b_pad = pl.cdiv(b, tb) * tb
    if b_pad != b:
        x = jnp.pad(x, ((0, 0), (0, b_pad - b), (0, 0)))
    grid = (b_pad // tb,)
    # "parallel" only pays off (v7x, 2 TCs) when there are >= 2 substantial steps.
    sem = ("arbitrary",) if grid[0] == 1 else ("parallel",)

    out = pl.pallas_call(
        textcnn_kernel,
        out_shape=jax.ShapeDtypeStruct((b_pad, OUT_PAD), jnp.float32),
        grid_spec=pltpu.PrefetchScalarGridSpec(
            num_scalar_prefetch=0,
            grid=grid,
            in_specs=[
                pl.BlockSpec((T_MAX, tb, KMAX * E), lambda i: (0, i, 0)),  # im2col tile
                pl.BlockSpec((KMAX * E, 3 * C), lambda i: (0, 0)),         # fused conv W
                pl.BlockSpec((T_MAX, 1, 3 * C), lambda i: (0, 0, 0)),      # bias+mask
                pl.BlockSpec((3 * C, OUT_PAD), lambda i: (0, 0)),          # fc W (padded)
                pl.BlockSpec((1, OUT_PAD), lambda i: (0, 0)),              # fc b (padded)
            ],
            out_specs=pl.BlockSpec((tb, OUT_PAD), lambda i: (i, 0)),
        ),
        compiler_params=pltpu.CompilerParams(dimension_semantics=sem),
    )(x, params['wf'], params['bm'], params['wfc_pad'], params['bfc_pad'])

    return out[:b, :NUM_CLASSES]


def fuse_params(w3, b3, w4, b4, w5, b5, wfc, bfc):
    """Build the fused/padded kernel-side parameters from per-branch weights."""
    def taps(w, k):
        # (k, E, C) -> (KMAX*E, C): zero-pad missing taps, flatten tap-major so
        # row dk*E + e matches the im2col feature layout fed to the kernel.
        return jnp.pad(w, ((0, KMAX - k), (0, 0), (0, 0))).reshape(KMAX * E, C)

    wf = jnp.concatenate([taps(w3, KS[0]), taps(w4, KS[1]), taps(w5, KS[2])],
                         axis=-1)                                      # (160, 384)
    bf = jnp.concatenate([b3, b4, b5], axis=-1)                        # (1, 384)

    # Conv bias fused with a -1e9 penalty for positions invalid in the shorter
    # T ranges of the k=4/5 branches: relu(x - 1e9) == 0 exactly, so masked
    # positions never win the max-pool (valid post-ReLU values are >= 0).
    limit = jnp.concatenate(
        [jnp.full((C,), L - k + 1, jnp.int32) for k in KS])            # (384,)
    t = jnp.arange(T_MAX, dtype=jnp.int32)[:, None, None]              # (T_MAX,1,1)
    bm = bf.reshape(1, 1, 3 * C) + jnp.where(t < limit[None, None, :], 0.0, -1e9)

    wfc_pad = jnp.zeros((3 * C, OUT_PAD), jnp.float32).at[:, :NUM_CLASSES].set(wfc)
    bfc_pad = jnp.zeros((1, OUT_PAD), jnp.float32).at[:, :NUM_CLASSES].set(bfc)
    return (wf.astype(jnp.bfloat16), bm.astype(jnp.float32),
            wfc_pad.astype(jnp.bfloat16), bfc_pad.astype(jnp.float32))


def init_params(key):
    """Deterministic synthetic parameters matching the PyTorch shapes."""
    keys = jax.random.split(key, 9)
    # Embedding(vocab, E, padding_idx=0): row 0 zeroed.
    emb_table = 0.1 * jax.random.normal(keys[0], (V, E), jnp.float32)
    emb_table = emb_table.at[0].set(0.0)

    def conv_params(k, wkey, bkey):
        # torch Conv2d weight is (C, 1, k, E); stored here as (k, E, C).
        w = 0.05 * jax.random.normal(wkey, (k, E, C), jnp.float32)
        b = 0.05 * jax.random.normal(bkey, (1, C), jnp.float32)
        return w, b

    w3, b3 = conv_params(KS[0], keys[1], keys[2])
    w4, b4 = conv_params(KS[1], keys[3], keys[4])
    w5, b5 = conv_params(KS[2], keys[5], keys[6])

    # NOTE: the PyTorch module zero-inits fc (nn.init.constant_(0)), which makes
    # the output identically zero and a correctness check vacuous.  Small random
    # fc weights are used instead; forward-pass semantics are identical.
    wfc = 0.05 * jax.random.normal(keys[7], (3 * C, NUM_CLASSES), jnp.float32)
    bfc = 0.05 * jax.random.normal(keys[8], (1, NUM_CLASSES), jnp.float32)

    wf, bm, wfc_pad, bfc_pad = fuse_params(w3, b3, w4, b4, w5, b5, wfc, bfc)
    return dict(emb_table=emb_table,
                w3=w3, b3=b3, w4=w4, b4=b4, w5=w5, b5=b5,
                wfc=wfc, bfc=bfc,
                wf=wf, bm=bm, wfc_pad=wfc_pad, bfc_pad=bfc_pad)


def textcnn_reference(tokens, params):
    """Pure-JAX reference following the PyTorch per-branch structure."""
    emb = params['emb_table'][tokens].astype(jnp.float32)              # (B, L, E)
    feats = []
    for (w, b, k) in ((params['w3'], params['b3'], KS[0]),
                      (params['w4'], params['b4'], KS[1]),
                      (params['w5'], params['b5'], KS[2])):
        t = L - k + 1
        acc = jnp.zeros((tokens.shape[0], t, C), jnp.float32)
        for dk in range(k):
            acc = acc + jnp.einsum('bte,ec->btc', emb[:, dk:dk + t, :], w[dk])
        acc = jnp.maximum(acc + b, 0.0)
        feats.append(jnp.max(acc, axis=1))
    f = jnp.concatenate(feats, axis=-1)                                # (B, 3*C)
    return f @ params['wfc'] + params['bfc']


if __name__ == "__main__":
    key = jax.random.PRNGKey(0)
    pkey, tkey = jax.random.split(key)
    params = init_params(pkey)
    tokens = jax.random.randint(tkey, (B, L), 0, V, dtype=jnp.int32)   # x: (B, L) ids

    out = jax.block_until_ready(textcnn_forward(tokens, params))
    assert out.shape == (B, NUM_CLASSES) and out.dtype == jnp.float32

    ref = jax.block_until_ready(textcnn_reference(tokens, params))
    err = float(jnp.max(jnp.abs(out - ref)))
    # Tolerance covers bf16 matmul operands in the kernel vs the (TPU default
    # reduced-precision) f32 reference; structural errors would be far larger.
    assert err < 2e-2, f"max |kernel - reference| = {err}"
    print("KERNEL_OK")
</pallas_src>

<mosaic_0001>
module attributes {stable_mosaic.version = 11 : i64} {
  func.func @textcnn_kernel(%arg0: i32, %arg1: memref<14x16x160xbf16, #tpu.memory_space<vmem>>, %arg2: memref<160x384xbf16, #tpu.memory_space<vmem>>, %arg3: memref<14x1x384xf32, #tpu.memory_space<vmem>>, %arg4: memref<384x128xbf16, #tpu.memory_space<vmem>>, %arg5: memref<1x128xf32, #tpu.memory_space<vmem>>, %arg6: memref<16x128xf32, #tpu.memory_space<vmem>>) attributes {dimension_semantics = [#tpu.dimension_semantics<arbitrary>], iteration_bounds = array<i64: 1>, scalar_prefetch = 0 : i64, scratch_operands = 0 : i64, tpu.core_type = #tpu.core_type<tc>, window_params = [{transform_indices = @transform_0, window_bounds = array<i64: 14, 16, 160>}, {pipeline_mode = #tpu.pipeline_mode<synchronous>, transform_indices = @transform_1, window_bounds = array<i64: 160, 384>}, {pipeline_mode = #tpu.pipeline_mode<synchronous>, transform_indices = @transform_2, window_bounds = array<i64: 14, 1, 384>}, {pipeline_mode = #tpu.pipeline_mode<synchronous>, transform_indices = @transform_3, window_bounds = array<i64: 384, 128>}, {pipeline_mode = #tpu.pipeline_mode<synchronous>, transform_indices = @transform_4, window_bounds = array<i64: 1, 128>}, {transform_indices = @transform_5, window_bounds = array<i64: 16, 128>}]} {
    %c0 = arith.constant 0 : index
    %c0_0 = arith.constant 0 : index
    %c0_1 = arith.constant 0 : index
    %0 = vector.load %arg1[%c0, %c0_0, %c0_1] : memref<14x16x160xbf16, #tpu.memory_space<vmem>>, vector<14x16x160xbf16>
    %1 = vector.shape_cast %0 : vector<14x16x160xbf16> to vector<224x160xbf16>
    %c0_2 = arith.constant 0 : index
    %c0_3 = arith.constant 0 : index
    %2 = vector.load %arg2[%c0_2, %c0_3] : memref<160x384xbf16, #tpu.memory_space<vmem>>, vector<160x384xbf16>
    %cst = arith.constant dense<0.000000e+00> : vector<224x384xf32>
    %3 = tpu.matmul %1, %2, %cst {dimension_numbers = #tpu.dot_dimension_numbers<[1], [0], [0], [1], [0, 0, 1, 1], [], []>} : vector<224x160xbf16>, vector<160x384xbf16>, vector<224x384xf32> -> vector<224x384xf32>
    %4 = vector.shape_cast %3 : vector<224x384xf32> to vector<14x16x384xf32>
    %c0_4 = arith.constant 0 : index
    %c0_5 = arith.constant 0 : index
    %c0_6 = arith.constant 0 : index
    %5 = vector.load %arg3[%c0_4, %c0_5, %c0_6] : memref<14x1x384xf32, #tpu.memory_space<vmem>>, vector<14x1x384xf32>
    %6 = vector.broadcast %5 : vector<14x1x384xf32> to vector<14x16x384xf32>
    %7 = arith.addf %4, %6 : vector<14x16x384xf32>
    %cst_7 = arith.constant 0.000000e+00 : f32
    %8 = vector.broadcast %cst_7 : f32 to vector<14x16x384xf32>
    %9 = arith.maximumf %7, %8 : vector<14x16x384xf32>
    %cst_8 = arith.constant dense<0xFF800000> : vector<16x384xf32>
    %10 = vector.multi_reduction <maximumf>, %9, %cst_8 [0] : vector<14x16x384xf32> to vector<16x384xf32>
    %11 = arith.truncf %10 : vector<16x384xf32> to vector<16x384xbf16>
    %c0_9 = arith.constant 0 : index
    %c0_10 = arith.constant 0 : index
    %12 = vector.load %arg4[%c0_9, %c0_10] : memref<384x128xbf16, #tpu.memory_space<vmem>>, vector<384x128xbf16>
    %cst_11 = arith.constant dense<0.000000e+00> : vector<16x128xf32>
    %13 = tpu.matmul %11, %12, %cst_11 {dimension_numbers = #tpu.dot_dimension_numbers<[1], [0], [0], [1], [0, 0, 1, 1], [], []>} : vector<16x384xbf16>, vector<384x128xbf16>, vector<16x128xf32> -> vector<16x128xf32>
    %c0_12 = arith.constant 0 : index
    %c0_13 = arith.constant 0 : index
    %14 = vector.load %arg5[%c0_12, %c0_13] : memref<1x128xf32, #tpu.memory_space<vmem>>, vector<1x128xf32>
    %15 = vector.broadcast %14 : vector<1x128xf32> to vector<16x128xf32>
    %16 = arith.addf %13, %15 : vector<16x128xf32>
    %c0_14 = arith.constant 0 : index
    %c0_15 = arith.constant 0 : index
    %17 = vector.load %arg6[%c0_14, %c0_15] : memref<16x128xf32, #tpu.memory_space<vmem>>, vector<16x128xf32>
    tpu.vector_store %arg6[%c0_14, %c0_15], %16 {strides = array<i32>} : memref<16x128xf32, #tpu.memory_space<vmem>>, vector<16x128xf32>,
    return
  }
  func.func @transform_0(%arg0: i32) -> (i32, i32, i32) {
    %c0_i32 = arith.constant 0 : i32
    %c0_i32_0 = arith.constant 0 : i32
    %c0_i32_1 = arith.constant 0 : i32
    return %c0_i32, %arg0, %c0_i32_0 : i32, i32, i32
  }
  func.func @transform_1(%arg0: i32) -> (i32, i32) {
    %c0_i32 = arith.constant 0 : i32
    %c0_i32_0 = arith.constant 0 : i32
    %c0_i32_1 = arith.constant 0 : i32
    return %c0_i32, %c0_i32_0 : i32, i32
  }
  func.func @transform_2(%arg0: i32) -> (i32, i32, i32) {
    %c0_i32 = arith.constant 0 : i32
    %c0_i32_0 = arith.constant 0 : i32
    %c0_i32_1 = arith.constant 0 : i32
    %c0_i32_2 = arith.constant 0 : i32
    return %c0_i32, %c0_i32_0, %c0_i32_1 : i32, i32, i32
  }
  func.func @transform_3(%arg0: i32) -> (i32, i32) {
    %c0_i32 = arith.constant 0 : i32
    %c0_i32_0 = arith.constant 0 : i32
    %c0_i32_1 = arith.constant 0 : i32
    return %c0_i32, %c0_i32_0 : i32, i32
  }
  func.func @transform_4(%arg0: i32) -> (i32, i32) {
    %c0_i32 = arith.constant 0 : i32
    %c0_i32_0 = arith.constant 0 : i32
    %c0_i32_1 = arith.constant 0 : i32
    return %c0_i32, %c0_i32_0 : i32, i32
  }
  func.func @transform_5(%arg0: i32) -> (i32, i32) {
    %c0_i32 = arith.constant 0 : i32
    %c0_i32_0 = arith.constant 0 : i32
    return %arg0, %c0_i32 : i32, i32
  }
}

</mosaic_0001>

<bundles_post_ra>
// kernel: textcnn_forward.1
= control target key start
LH: loop header
LB: loop body
LE: loop exit
PB: predicated region body
PF: predicated region fallthrough
CT: control target
= control target key end

     0   :  { %vm375_vm0 = vcmask 261120   ;;  %s2916_s1 = inlined_call_operand.vmem [shape: bf16[160,384], index: 1, kind: input, shape index: {}]   ;;  %s2917_s0 = inlined_call_operand.vmem [shape: bf16[14,16,160], index: 0, kind: input, shape index: {}]   ;;  %s2918_s2 = inlined_call_operand.vmem [shape: f32[14,1,384], index: 2, kind: input, shape index: {}]   ;;  %s2919_s3 = inlined_call_operand.vmem [shape: bf16[384,128], index: 3, kind: input, shape index: {}]   ;;  %s2920_s4 = inlined_call_operand.vmem [shape: f32[1,128], index: 4, kind: input, shape index: {}]   ;;  %s2921_s5 = inlined_call_operand.vmem [shape: f32[16,128], index: 5, kind: output, shape index: {}]  }
   0x1   :  { %v1695_v0 = vld [vmem:[%s2916_s1 + $0xa8] sm:$0xf]  ;;  %v1917_v1 = vld [vmem:[%s2916_s1 + $0xb0] sm:$0xf0]  ;;  %v1719_v2 = vld [vmem:[%s2916_s1 + $0xd8] sm:$0xf] }
   0x2   :  { %v1696_v3 = vor.u32 %v1917_v1, %v1695_v0  ;;  %v1923_v4 = vld [vmem:[%s2916_s1 + $0xe0] sm:$0xf0]  ;;  %v1922_v5 = vld [vmem:[%s2916_s1 + $0xdc] sm:$0xf]  ;;  %v1721_v6 = vld [vmem:[%s2916_s1 + $0xe4] sm:$0xf0] }
   0x3   :  { %v1720_v7 = vor.u32 %v1923_v4, %v1719_v2  ;;  %v2002_v8 = vor.u32 %v1922_v5, %v1721_v6  ;;  %v1683_v9 = vld [vmem:[%s2916_s1 + $0x90] sm:$0xf]  ;;  %v1914_v10 = vld [vmem:[%s2916_s1 + $0x98] sm:$0xf0]  ;;  %v1707_v11 = vld [vmem:[%s2916_s1 + $0xc0] sm:$0xf] }
   0x4   :  { %418 = vmatpush.bf16.msra.mxu0 %v1696_v3  ;;  %v1684_v12 = vor.u32 %v1914_v10, %v1683_v9  ;;  %v1920_v13 = vld [vmem:[%s2916_s1 + $0xc8] sm:$0xf0]  ;;  %v1919_v14 = vld [vmem:[%s2916_s1 + $0xc4] sm:$0xf]  ;;  %v1709_v15 = vld [vmem:[%s2916_s1 + $0xcc] sm:$0xf0] }
   0x5   :  { %503 = vmatpush.bf16.msra.mxu1 %v1720_v7  ;;  %1949 = vmatpush.bf16.msra.mxu2 %v1720_v7  ;;  %v1708_v16 = vor.u32 %v1920_v13, %v1707_v11  ;;  %v1867_v17 = vld [vmem:[%s2917_s0 + $0x4] sm:$0xf]  ;;  %v1501_v18 = vld [vmem:[%s2917_s0 + $0x8] sm:$0xf0]  ;;  %v1885_v19 = vld [vmem:[%s2917_s0 + $0x94] sm:$0xf]  ;;  %v2032_v20 = vor.u32 %v1919_v14, %v1709_v15 }
   0x6   :  { %1951 = vmatpush.bf16.msra.mxu3 %v2002_v8  ;;  %v1573_v21 = vld [vmem:[%s2917_s0 + $0x98] sm:$0xf0]  ;;  %v1877_v22 = vld [vmem:[%s2917_s0 + $0x54] sm:$0xf]  ;;  %v1727_v24 = vld [vmem:[%s2916_s1 + $0xe0] sm:$0xf]  ;;  %v2052_v27 = vor.u32 %v1867_v17, %v1501_v18 }
   0x7   :  { %v1541_v23 = vld [vmem:[%s2917_s0 + $0x58] sm:$0xf0]  ;;  %v1924_v25 = vld [vmem:[%s2916_s1 + $0xe8] sm:$0xf0]  ;;  %v1671_v26 = vld [vmem:[%s2916_s1 + $0x78] sm:$0xf]  ;;  %v2054_v28 = vor.u32 %v1885_v19, %v1573_v21 }
   0x8   :  { %419 = vmatpush.bf16.msra.mxu0 %v1684_v12  ;;  %v1728_v29 = vor.u32 %v1924_v25, %v1727_v24  ;;  %v1911_v30 = vld [vmem:[%s2916_s1 + $0x80] sm:$0xf0]  ;;  %v2059_v31 = vor.u32 %v1877_v22, %v1541_v23  ;;  %v1703_v33 = vld [vmem:[%s2916_s1 + $0xb0] sm:$0xf]  ;;  %v1918_v34 = vld [vmem:[%s2916_s1 + $0xb8] sm:$0xf0] }
   0x9   :  { %504 = vmatpush.bf16.msra.mxu1 %v1708_v16  ;;  %1950 = vmatpush.bf16.msra.mxu2 %v1708_v16  ;;  %v1672_v32 = vor.u32 %v1911_v30, %v1671_v26  ;;  %v1659_v35 = vld [vmem:[%s2916_s1 + $0x60] sm:$0xf]  ;;  %v1908_v36 = vld [vmem:[%s2916_s1 + $0x68] sm:$0xf0]  ;;  %v1704_v37 = vor.u32 %v1918_v34, %v1703_v33  ;;  %v1647_v39 = vld [vmem:[%s2916_s1 + $0x48] sm:$0xf] }
   0xa   :  { %1952 = vmatpush.bf16.msra.mxu3 %v2032_v20  ;;  %v1660_v38 = vor.u32 %v1908_v36, %v1659_v35  ;;  %v1905_v40 = vld [vmem:[%s2916_s1 + $0x50] sm:$0xf0]  ;;  %v1691_v41 = vld [vmem:[%s2916_s1 + $0x98] sm:$0xf]  ;;  %v1915_v42 = vld [vmem:[%s2916_s1 + $0xa0] sm:$0xf0] }
   0xb   :  { %v1692_v43 = vor.u32 %v1915_v42, %v1691_v41  ;;  %v1648_v44 = vor.u32 %v1905_v40, %v1647_v39  ;;  %v1635_v45 = vld [vmem:[%s2916_s1 + $0x30] sm:$0xf]  ;;  %v1902_v46 = vld [vmem:[%s2916_s1 + $0x38] sm:$0xf0]  ;;  %v1869_v47 = vld [vmem:[%s2917_s0 + $0x14] sm:$0xf] }
   0xc   :  { %1729 = vmatmul.msk.bf16.vlgmr.msra.gmra.mxu1 %vm375_vm0, %v2052_v27  ;;  %1738 = vmatmul.msk.bf16.vlgmr.msra.gmra.mxu2 %vm375_vm0, %v2054_v28  ;;  %v1509_v48 = vld [vmem:[%s2917_s0 + $0x18] sm:$0xf0]  ;;  %v1679_v49 = vld [vmem:[%s2916_s1 + $0x80] sm:$0xf]  ;;  %v1912_v50 = vld [vmem:[%s2916_s1 + $0x88] sm:$0xf0]  ;;  %v1636_v51 = vor.u32 %v1902_v46, %v1635_v45 }
   0xd   :  { %1748 = vmatmul.msk.bf16.vlgmr.msra.gmra.mxu3 %vm375_vm0, %v2059_v31  ;;  %420 = vmatpush.bf16.msra.mxu0 %v1672_v32  ;;  %v1887_v52 = vld [vmem:[%s2917_s0 + $0xa4] sm:$0xf]  ;;  %v1581_v53 = vld [vmem:[%s2917_s0 + $0xa8] sm:$0xf0]  ;;  %v1680_v55 = vor.u32 %v1912_v50, %v1679_v49  ;;  %v1623_v57 = vld [vmem:[%s2916_s1 + $0x18] sm:$0xf]  ;;  %v2128_v59 = vor.u32 %v1869_v47, %v1509_v48 }
   0xe   :  { %819 = vmatpush.bf16.msrb.mxu3 %v1728_v29  ;;  %734 = vmatpush.bf16.msrb.mxu1 %v1704_v37  ;;  %v1879_v54 = vld [vmem:[%s2917_s0 + $0x64] sm:$0xf]  ;;  %v1549_v56 = vld [vmem:[%s2917_s0 + $0x68] sm:$0xf0]  ;;  %v2130_v60 = vor.u32 %v1887_v52, %v1581_v53  ;;  %v1611_v63 = vld [vmem:[%s2916_s1] sm:$0xf] }
   0xf   :  { %v1899_v58 = vld [vmem:[%s2916_s1 + $0x20] sm:$0xf0]  ;;  %v2132_v61 = vor.u32 %v1879_v54, %v1549_v56  ;;  %v1896_v0 = vld [vmem:[%s2916_s1 + $0x8] sm:$0xf0]  ;;  %v1697_v2 = vld [vmem:[%s2916_s1 + $0xb4] sm:$0xf0] }
  0x10   :  { %v1624_v62 = vor.u32 %v1899_v58, %v1623_v57  ;;  %v1916_v1 = vld [vmem:[%s2916_s1 + $0xac] sm:$0xf]  ;;  %v1499_v3 = vld [vmem:[%s2917_s0] sm:$0xf]  ;;  %v1612_v5 = vor.u32 %v1896_v0, %v1611_v63  ;;  %v1868_v6 = vld [vmem:[%s2917_s0 + $0x4] sm:$0xf0] }
  0x11   :  { %421 = vmatpush.bf16.msra.mxu0 %v1660_v38  ;;  %v1700_v4 = vor.u32 %v1916_v1, %v1697_v2  ;;  %v1913_v7 = vld [vmem:[%s2916_s1 + $0x94] sm:$0xf]  ;;  %v1685_v9 = vld [vmem:[%s2916_s1 + $0x9c] sm:$0xf0]  ;;  %v2164_v11 = vor.u32 %v1868_v6, %v1499_v3  ;;  %v1871_v12 = vld [vmem:[%s2917_s0 + $0x24] sm:$0xf] }
  0x12   :  { %735 = vmatpush.bf16.msrb.mxu1 %v1692_v43  ;;  %v1688_v10 = vor.u32 %v1913_v7, %v1685_v9  ;;  %v1517_v13 = vld [vmem:[%s2917_s0 + $0x28] sm:$0xf0]  ;;  %v1910_v14 = vld [vmem:[%s2916_s1 + $0x7c] sm:$0xf]  ;;  %v1673_v15 = vld [vmem:[%s2916_s1 + $0x84] sm:$0xf0] }
  0x13   :  { %576 = vmatpush.bf16.msrb.mxu2 %v1700_v4  ;;  %v1667_v16 = vld [vmem:[%s2916_s1 + $0x68] sm:$0xf]  ;;  %v1909_v17 = vld [vmem:[%s2916_s1 + $0x70] sm:$0xf0]  ;;  %v1907_v18 = vld [vmem:[%s2916_s1 + $0x64] sm:$0xf]  ;;  %v2205_v29 = vor.u32 %v1871_v12, %v1517_v13 }
  0x14   :  { %v1889_v19 = vld [vmem:[%s2917_s0 + $0xb4] sm:$0xf]  ;;  %v1589_v21 = vld [vmem:[%s2917_s0 + $0xb8] sm:$0xf0]  ;;  %v1668_v22 = vor.u32 %v1909_v17, %v1667_v16  ;;  %v1661_v23 = vld [vmem:[%s2916_s1 + $0x6c] sm:$0xf0] }
  0x15   :  { %422 = vmatpush.bf16.msra.mxu0 %v1648_v44  ;;  %v1881_v24 = vld [vmem:[%s2917_s0 + $0x74] sm:$0xf]  ;;  %v1557_v25 = vld [vmem:[%s2917_s0 + $0x78] sm:$0xf0]  ;;  %v1664_v26 = vor.u32 %v1907_v18, %v1661_v23  ;;  %v2207_v30 = vor.u32 %v1889_v19, %v1589_v21  ;;  %v1904_v33 = vld [vmem:[%s2916_s1 + $0x4c] sm:$0xf] }
  0x16   :  { %736 = vmatpush.bf16.msrb.mxu1 %v1680_v55  ;;  %v2209_v32 = vor.u32 %v1881_v24, %v1557_v25  ;;  %v1649_v34 = vld [vmem:[%s2916_s1 + $0x54] sm:$0xf0]  ;;  %v1901_v37 = vld [vmem:[%s2916_s1 + $0x34] sm:$0xf]  ;;  %v1637_v38 = vld [vmem:[%s2916_s1 + $0x3c] sm:$0xf0] }
  0x17   :  { %577 = vmatpush.bf16.msrb.mxu2 %v1688_v10  ;;  %v1652_v35 = vor.u32 %v1904_v33, %v1649_v34  ;;  %v1870_v36 = vld [vmem:[%s2917_s0 + $0x14] sm:$0xf0]  ;;  %v1640_v39 = vor.u32 %v1901_v37, %v1637_v38  ;;  %v1873_v41 = vld [vmem:[%s2917_s0 + $0x34] sm:$0xf]  ;;  %v1525_v42 = vld [vmem:[%s2917_s0 + $0x38] sm:$0xf0] }
  0x18   :  { %v1891_v43 = vld [vmem:[%s2917_s0 + $0xc4] sm:$0xf]  ;;  %v1597_v44 = vld [vmem:[%s2917_s0 + $0xc8] sm:$0xf0]  ;;  %v1898_v45 = vld [vmem:[%s2916_s1 + $0x1c] sm:$0xf] }
  0x19   :  { %423 = vmatpush.bf16.msra.mxu0 %v1636_v51  ;;  %v1625_v46 = vld [vmem:[%s2916_s1 + $0x24] sm:$0xf0]  ;;  %v1921_v48 = vld [vmem:[%s2916_s1 + $0xd0] sm:$0xf0]  ;;  %v1895_v50 = vld [vmem:[%s2916_s1 + $0x4] sm:$0xf]  ;;  %v2282_v63 = vor.u32 %v1891_v43, %v1597_v44 }
  0x1a   :  { %737 = vmatpush.bf16.msrb.mxu1 %v1668_v22  ;;  %v1715_v47 = vld [vmem:[%s2916_s1 + $0xc8] sm:$0xf]  ;;  %v1628_v49 = vor.u32 %v1898_v45, %v1625_v46  ;;  %v1613_v52 = vld [vmem:[%s2916_s1 + $0xc] sm:$0xf0]  ;;  %v1906_v54 = vld [vmem:[%s2916_s1 + $0x58] sm:$0xf0] }
  0x1b   :  { %v1716_v51 = vor.u32 %v1921_v48, %v1715_v47  ;;  %v1655_v53 = vld [vmem:[%s2916_s1 + $0x50] sm:$0xf]  ;;  %v1883_v55 = vld [vmem:[%s2917_s0 + $0x84] sm:$0xf]  ;;  %v1565_v56 = vld [vmem:[%s2917_s0 + $0x88] sm:$0xf0]  ;;  %v1616_v57 = vor.u32 %v1895_v50, %v1613_v52 }
  0x1c   :  { %1730 = vmatmul.msk.bf16.gmra.mxu1 %vm375_vm0, %v2128_v59  ;;  %1739 = vmatmul.msk.bf16.gmra.mxu2 %vm375_vm0, %v2130_v60  ;;  %v1656_v58 = vor.u32 %v1906_v54, %v1655_v53  ;;  %v2284_v0 = vor.u32 %v1883_v55, %v1565_v56  ;;  %v1515_v1 = vld [vmem:[%s2917_s0 + $0x20] sm:$0xf]  ;;  %v1872_v2 = vld [vmem:[%s2917_s0 + $0x24] sm:$0xf0]  ;;  %v1875_v4 = vld [vmem:[%s2917_s0 + $0x44] sm:$0xf] }
  0x1d   :  { %1749 = vmatmul.msk.bf16.gmra.mxu3 %vm375_vm0, %v2132_v61  ;;  %424 = vmatpush.bf16.msra.mxu0 %v1624_v62  ;;  %v2280_v62 = vor.u32 %v1873_v41, %v1525_v42  ;;  %v2298_v3 = vor.u32 %v1872_v2, %v1515_v1  ;;  %v1893_v6 = vld [vmem:[%s2917_s0 + $0xd4] sm:$0xf]  ;;  %v1605_v7 = vld [vmem:[%s2917_s0 + $0xd8] sm:$0xf0]  ;;  %v1523_v12 = vld [vmem:[%s2917_s0 + $0x30] sm:$0xf] }
  0x1e   :  { %820 = vmatpush.bf16.msrb.mxu3 %v1716_v51  ;;  %738 = vmatpush.bf16.msrb.mxu1 %v1656_v58  ;;  %v2315_v10 = vor.u32 %v1893_v6, %v1605_v7  ;;  %v1874_v13 = vld [vmem:[%s2917_s0 + $0x34] sm:$0xf0]  ;;  %v1531_v17 = vld [vmem:[%s2917_s0 + $0x40] sm:$0xf]  ;;  %v1876_v18 = vld [vmem:[%s2917_s0 + $0x44] sm:$0xf0] }
  0x1f   :  { %v2335_v16 = vor.u32 %v1874_v13, %v1523_v12  ;;  %v1631_v19 = vld [vmem:[%s2916_s1 + $0x20] sm:$0xf]  ;;  %v1900_v21 = vld [vmem:[%s2916_s1 + $0x28] sm:$0xf0]  ;;  %v2355_v23 = vor.u32 %v1876_v18, %v1531_v17  ;;  %v1539_v24 = vld [vmem:[%s2917_s0 + $0x50] sm:$0xf] }
  0x20   :  { %v1632_v22 = vor.u32 %v1900_v21, %v1631_v19  ;;  %v1878_v25 = vld [vmem:[%s2917_s0 + $0x54] sm:$0xf0]  ;;  %v1619_v33 = vld [vmem:[%s2916_s1 + $0x8] sm:$0xf]  ;;  %v1897_v34 = vld [vmem:[%s2916_s1 + $0x10] sm:$0xf0] }
  0x21   :  { %425 = vmatpush.bf16.msra.mxu0 %v1612_v5  ;;  %v1533_v5 = vld [vmem:[%s2917_s0 + $0x48] sm:$0xf0]  ;;  %v1882_v41 = vld [vmem:[%s2917_s0 + $0x74] sm:$0xf0]  ;;  %v1884_v50 = vld [vmem:[%s2917_s0 + $0x84] sm:$0xf0] }
  0x22   :  { %v2313_v9 = vor.u32 %v1875_v4, %v1533_v5  ;;  %v2438_v4 = vld [vmem:[%s2918_s2] sm:$0x7]  ;;  %v2447_v5 = vld [vmem:[%s2918_s2 + $0x3] sm:$0x7]  ;;  %v1571_v6 = vld [vmem:[%s2917_s0 + $0x90] sm:$0xf] }
  0x23   :  { %v1886_v7 = vld [vmem:[%s2917_s0 + $0x94] sm:$0xf0]  ;;  %v920_v12 = vperm.slane %v2438_v4, 0 }
  0x24   :  { %426 = vmatmul.bf16.vlgmr.msra.gmra.mxu0 %v2164_v11 }
  0x25   :  { %661 = vmatpush.bf16.msrb.mxu0 %v2002_v8  ;;  %v1676_v8 = vor.u32 %v1910_v14, %v1673_v15  ;;  %v1643_v14 = vld [vmem:[%s2916_s1 + $0x38] sm:$0xf]  ;;  %v1903_v15 = vld [vmem:[%s2916_s1 + $0x40] sm:$0xf0] }
  0x27   :  { %578 = vmatpush.bf16.msrb.mxu2 %v1676_v8  ;;  %v1644_v8 = vor.u32 %v1903_v15, %v1643_v14  ;;  %v923_v14 = vperm.slane %v2447_v5, 0  ;;  %v2461_v15 = vor.u32 %v1886_v7, %v1571_v6 }
  0x29   :  { %662 = vmatpush.bf16.msrb.mxu0 %v2032_v20  ;;  %v1507_v20 = vld [vmem:[%s2917_s0 + $0x10] sm:$0xf]  ;;  %739 = vmatpush.bf16.msrb.mxu1 %v1644_v8 }
  0x2a   :  { %v2235_v40 = vor.u32 %v1870_v36, %v1507_v20  ;;  %v1620_v20 = vor.u32 %v1897_v34, %v1619_v33  ;;  %v1880_v36 = vld [vmem:[%s2917_s0 + $0x64] sm:$0xf0] }
  0x2b   :  { %579 = vmatpush.bf16.msrb.mxu2 %v1664_v26  ;;  %v2369_v26 = vor.u32 %v1878_v25, %v1539_v24 }
  0x2c   :  { %1731 = vmatmul.msk.bf16.gmra.mxu1 %vm375_vm0, %v2205_v29  ;;  %1740 = vmatmul.msk.bf16.gmra.mxu2 %vm375_vm0, %v2207_v30 }
  0x2d   :  { %1750 = vmatmul.msk.bf16.gmra.mxu3 %vm375_vm0, %v2209_v32  ;;  %740 = vmatpush.bf16.msrb.mxu1 %v1632_v22 }
  0x2f   :  { %580 = vmatpush.bf16.msrb.mxu2 %v1652_v35  ;;  %v1547_v35 = vld [vmem:[%s2917_s0 + $0x60] sm:$0xf] }
  0x30   :  { %v2389_v37 = vor.u32 %v1880_v36, %v1547_v35 }
  0x31   :  { %741 = vmatpush.bf16.msrb.mxu1 %v1620_v20 }
  0x33   :  { %581 = vmatpush.bf16.msrb.mxu2 %v1640_v39  ;;  %v1555_v39 = vld [vmem:[%s2917_s0 + $0x70] sm:$0xf] }
  0x34   :  { %431 = vmatmul.bf16.gmra.mxu0 %v2235_v40  ;;  %v2407_v44 = vor.u32 %v1882_v41, %v1555_v39  ;;  %v2475_v41 = vld [vmem:[%s2918_s2 + $0x6] sm:$0x7] }
  0x37   :  { %582 = vmatpush.bf16.msrb.mxu2 %v1628_v49  ;;  %v1563_v49 = vld [vmem:[%s2917_s0 + $0x80] sm:$0xf] }
  0x38   :  { %v2428_v53 = vor.u32 %v1884_v50, %v1563_v49 }
  0x3b   :  { %583 = vmatpush.bf16.msrb.mxu2 %v1616_v57 }
  0x3c   :  { %1732 = vmatmul.msk.bf16.gmra.mxu1 %vm375_vm0, %v2280_v62  ;;  %1741 = vmatmul.msk.bf16.gmra.mxu2 %vm375_vm0, %v2282_v63 }
  0x3d   :  { %1751 = vmatmul.msk.bf16.gmra.mxu3 %vm375_vm0, %v2284_v0 }
  0x44   :  { %436 = vmatmul.bf16.gmra.mxu0 %v2298_v3 }
  0x4c   :  { %1733 = vmatmul.msk.bf16.gmra.mxu1 %vm375_vm0, %v2313_v9  ;;  %1742 = vmatmul.msk.bf16.gmra.mxu2 %vm375_vm0, %v2315_v10 }
  0x4d   :  { %1752 = vmatmul.msk.bf16.gmra.mxu3 %vm375_vm0, %v2054_v28 }
  0x54   :  { %441 = vmatmul.bf16.gmra.mxu0 %v2335_v16 }
  0x5c   :  { %1734 = vmatmul.msk.bf16.gmra.mxu1 %vm375_vm0, %v2059_v31  ;;  %584 = vmatmul.bf16.vlgmr.msrb.gmra.mxu2 %v2164_v11 }
  0x5d   :  { %1753 = vmatmul.msk.bf16.gmra.mxu3 %vm375_vm0, %v2130_v60 }
  0x64   :  { %446 = vmatmul.bf16.gmra.mxu0 %v2355_v23 }
  0x6c   :  { %1735 = vmatmul.msk.bf16.gmra.mxu1 %vm375_vm0, %v2132_v61  ;;  %589 = vmatmul.bf16.gmra.mxu2 %v2235_v40 }
  0x6d   :  { %1754 = vmatmul.msk.bf16.gmra.mxu3 %vm375_vm0, %v2207_v30 }
  0x74   :  { %451 = vmatmul.bf16.gmra.mxu0 %v2369_v26 }
  0x7c   :  { %1736 = vmatmul.msk.bf16.gmra.mxu1 %vm375_vm0, %v2209_v32  ;;  %594 = vmatmul.bf16.gmra.mxu2 %v2298_v3 }
  0x7d   :  { %1755 = vmatmul.msk.bf16.gmra.mxu3 %vm375_vm0, %v2282_v63 }
  0x84   :  { %456 = vmatmul.bf16.gmra.mxu0 %v2389_v37 }
  0x89   :  { %v506_v38 = vpop.f32.mrf.mxu1 }
  0x8c   :  { %1737 = vmatmul.msk.bf16.gmra.mxu1 %vm375_vm0, %v2284_v0  ;;  %599 = vmatmul.bf16.gmra.mxu2 %v2335_v16 }
  0x8d   :  { %1756 = vmatmul.msk.bf16.gmra.mxu3 %vm375_vm0, %v2315_v10 }
  0x8f   :  { %v2403_v42 = vpop.f32.mrf.mxu2 }
  0x90   :  { %v2405_v43 = vpop.f32.mrf.mxu3 }
  0x91   :  { %v508_v45 = vpop.f32.mrf.mxu1 }
  0x94   :  { %461 = vmatmul.bf16.gmra.mxu0 %v2407_v44 }
  0x97   :  { %v2410_v46 = vpop.f32.mrf.mxu2 }
  0x98   :  { %v2412_v47 = vpop.f32.mrf.mxu3 }
  0x99   :  { %v511_v48 = vpop.f32.mrf.mxu1 }
  0x9c   :  { %604 = vmatmul.bf16.gmra.mxu2 %v2355_v23  ;;  %742 = vmatmul.bf16.vlgmr.msrb.gmra.mxu1 %v2164_v11 }
  0x9d   :  { %1757 = vmatmul.msk.bf16.vlgmr.msrb.gmra.mxu3 %vm375_vm0, %v2052_v27 }
  0x9f   :  { %v2424_v51 = vpop.f32.mrf.mxu2 }
  0xa0   :  { %v2426_v52 = vpop.f32.mrf.mxu3 }
  0xa1   :  { %v427_v54 = vpop.f32.mrf.mxu0  ;;  %v513_v55 = vpop.f32.mrf.mxu1 }
  0xa2   :  { %v507_v11 = vadd.f32 %v506_v38, %v427_v54 }
  0xa4   :  { %466 = vmatmul.bf16.gmra.mxu0 %v2428_v53  ;;  %v1004_v18 = vadd.f32 %v920_v12, %v507_v11  ;;  %v926_v11 = vperm.slane %v2475_v41, 0 }
  0xa6   :  { %v1088_v22 = vmax.f32 %v1004_v18, 0.0 }
  0xa7   :  { %v2431_v56 = vpop.f32.mrf.mxu2 }
  0xa8   :  { %v2433_v57 = vpop.f32.mrf.mxu3 }
  0xa9   :  { %v429_v58 = vpop.f32.mrf.mxu0  ;;  %v516_v1 = vpop.f32.mrf.mxu1 }
  0xaa   :  { %v509_v2 = vadd.f32 %v508_v45, %v429_v58  ;;  %v1579_v45 = vld [vmem:[%s2917_s0 + $0xa0] sm:$0xf] }
  0xac   :  { %609 = vmatmul.bf16.gmra.mxu2 %v2369_v26  ;;  %747 = vmatmul.bf16.gmra.mxu1 %v2235_v40  ;;  %v1007_v36 = vadd.f32 %v920_v12, %v509_v2 }
  0xad   :  { %1758 = vmatmul.msk.bf16.gmra.mxu3 %vm375_vm0, %v2128_v59 }
  0xae   :  { %v1091_v49 = vmax.f32 %v1007_v36, 0.0 }
  0xaf   :  { %v2456_v13 = vpop.f32.mrf.mxu2 }
  0xb0   :  { %v2458_v40 = vpop.f32.mrf.mxu3 }
  0xb1   :  { %v432_v8 = vpop.f32.mrf.mxu0  ;;  %v518_v17 = vpop.f32.mrf.mxu1 }
  0xb2   :  { %v512_v19 = vadd.f32 %v511_v48, %v432_v8  ;;  %v1888_v48 = vld [vmem:[%s2917_s0 + $0xa4] sm:$0xf0] }
  0xb3   :  { %v2488_v58 = vor.u32 %v1888_v48, %v1579_v45 }
  0xb4   :  { %v1010_v21 = vadd.f32 %v923_v14, %v512_v19  ;;  %471 = vmatmul.bf16.gmra.mxu0 %v2461_v15 }
  0xb6   :  { %v1094_v24 = vmax.f32 %v1010_v21, 0.0 }
  0xb7   :  { %v2464_v25 = vpop.f32.mrf.mxu2 }
  0xb8   :  { %v1172_v33 = vmax.f32 %v1088_v22, %v1094_v24  ;;  %v2466_v34 = vpop.f32.mrf.mxu3 }
  0xb9   :  { %v434_v20 = vpop.f32.mrf.mxu0  ;;  %v521_v35 = vpop.f32.mrf.mxu1 }
  0xba   :  { %v514_v38 = vadd.f32 %v513_v55, %v434_v20 }
  0xbc   :  { %v1013_v39 = vadd.f32 %v923_v14, %v514_v38  ;;  %614 = vmatmul.bf16.gmra.mxu2 %v2389_v37  ;;  %752 = vmatmul.bf16.gmra.mxu1 %v2298_v3 }
  0xbd   :  { %1759 = vmatmul.msk.bf16.gmra.mxu3 %vm375_vm0, %v2205_v29 }
  0xbe   :  { %v1097_v50 = vmax.f32 %v1013_v39, 0.0 }
  0xbf   :  { %v2483_v54 = vpop.f32.mrf.mxu2 }
  0xc0   :  { %v1211_v3 = vmax.f32 %v1091_v49, %v1097_v50  ;;  %v2485_v55 = vpop.f32.mrf.mxu3 }
  0xc1   :  { %v437_v2 = vpop.f32.mrf.mxu0  ;;  %v523_v6 = vpop.f32.mrf.mxu1 }
  0xc2   :  { %v517_v7 = vadd.f32 %v516_v1, %v437_v2  ;;  %v2502_v1 = vld [vmem:[%s2918_s2 + $0x9] sm:$0x7] }
  0xc3   :  { %v929_v45 = vperm.slane %v2502_v1, 0 }
  0xc4   :  { %v1016_v12 = vadd.f32 %v926_v11, %v517_v7  ;;  %476 = vmatmul.bf16.gmra.mxu0 %v2488_v58 }
  0xc6   :  { %v1100_v14 = vmax.f32 %v1016_v12, 0.0 }
  0xc7   :  { %v2491_v8 = vpop.f32.mrf.mxu2 }
  0xc8   :  { %v1173_v18 = vmax.f32 %v1172_v33, %v1100_v14  ;;  %v2493_v19 = vpop.f32.mrf.mxu3  ;;  %v1587_v33 = vld [vmem:[%s2917_s0 + $0xb0] sm:$0xf] }
  0xc9   :  { %v439_v21 = vpop.f32.mrf.mxu0  ;;  %v526_v22 = vpop.f32.mrf.mxu1 }
  0xca   :  { %v519_v24 = vadd.f32 %v518_v17, %v439_v21  ;;  %v1890_v17 = vld [vmem:[%s2917_s0 + $0xb4] sm:$0xf0] }
  0xcb   :  { %v2515_v48 = vor.u32 %v1890_v17, %v1587_v33 }
  0xcc   :  { %v1019_v20 = vadd.f32 %v926_v11, %v519_v24  ;;  %619 = vmatmul.bf16.gmra.mxu2 %v2407_v44  ;;  %757 = vmatmul.bf16.gmra.mxu1 %v2335_v16 }
  0xcd   :  { %1760 = vmatmul.msk.bf16.gmra.mxu3 %vm375_vm0, %v2280_v62 }
  0xce   :  { %v1103_v36 = vmax.f32 %v1019_v20, 0.0 }
  0xcf   :  { %v2510_v38 = vpop.f32.mrf.mxu2 }
  0xd0   :  { %2922 = vst [vmem:[#allocation2_spill] sm:$0xff] %v2510_v38  ;;  %v1212_v16 = vmax.f32 %v1211_v3, %v1103_v36  ;;  %v2512_v39 = vpop.f32.mrf.mxu3 }
  0xd1   :  { %v442_v49 = vpop.f32.mrf.mxu0  ;;  %v528_v50 = vpop.f32.mrf.mxu1 }
  0xd2   :  { %v522_v11 = vadd.f32 %v521_v35, %v442_v49  ;;  %v2529_v35 = vld [vmem:[%s2918_s2 + $0xc] sm:$0x7] }
  0xd3   :  { %v932_v49 = vperm.slane %v2529_v35, 0 }
  0xd4   :  { %v1022_v2 = vadd.f32 %v929_v45, %v522_v11  ;;  %481 = vmatmul.bf16.gmra.mxu0 %v2515_v48 }
  0xd6   :  { %v1106_v7 = vmax.f32 %v1022_v2, 0.0 }
  0xd7   :  { %v2518_v12 = vpop.f32.mrf.mxu2 }
  0xd8   :  { %2923 = vst [vmem:[#allocation3_spill] sm:$0xff] %v2518_v12  ;;  %v1174_v14 = vmax.f32 %v1173_v18, %v1106_v7  ;;  %v2520_v21 = vpop.f32.mrf.mxu3  ;;  %v1595_v18 = vld [vmem:[%s2917_s0 + $0xc0] sm:$0xf] }
  0xd9   :  { %2924 = vst [vmem:[#allocation4_spill] sm:$0xff] %v2520_v21  ;;  %v444_v24 = vpop.f32.mrf.mxu0  ;;  %v531_v3 = vpop.f32.mrf.mxu1 }
  0xda   :  { %v524_v20 = vadd.f32 %v523_v6, %v444_v24  ;;  %v1892_v6 = vld [vmem:[%s2917_s0 + $0xc4] sm:$0xf0] }
  0xdb   :  { %v2542_v11 = vor.u32 %v1892_v6, %v1595_v18 }
  0xdc   :  { %v1025_v36 = vadd.f32 %v929_v45, %v524_v20  ;;  %624 = vmatmul.bf16.gmra.mxu2 %v2428_v53  ;;  %762 = vmatmul.bf16.gmra.mxu1 %v2355_v23 }
  0xdd   :  { %1761 = vmatmul.msk.bf16.gmra.mxu3 %vm375_vm0, %v2313_v9 }
  0xde   :  { %v1109_v33 = vmax.f32 %v1025_v36, 0.0 }
  0xdf   :  { %v2537_v17 = vpop.f32.mrf.mxu2 }
  0xe0   :  { %2925 = vst [vmem:[#allocation5_spill] sm:$0xff] %v2537_v17  ;;  %v1213_v23 = vmax.f32 %v1212_v16, %v1109_v33  ;;  %v2539_v45 = vpop.f32.mrf.mxu3 }
  0xe1   :  { %2926 = vst [vmem:[#allocation6_spill] sm:$0xff] %v2539_v45  ;;  %v447_v2 = vpop.f32.mrf.mxu0  ;;  %v533_v7 = vpop.f32.mrf.mxu1 }
  0xe2   :  { %v527_v24 = vadd.f32 %v526_v22, %v447_v2  ;;  %v2556_v22 = vld [vmem:[%s2918_s2 + $0xf] sm:$0x7] }
  0xe4   :  { %v1028_v20 = vadd.f32 %v932_v49, %v527_v24  ;;  %486 = vmatmul.bf16.gmra.mxu0 %v2542_v11 }
  0xe6   :  { %v1112_v21 = vmax.f32 %v1028_v20, 0.0 }
  0xe7   :  { %v2545_v12 = vpop.f32.mrf.mxu2 }
  0xe8   :  { %2927 = vst [vmem:[#allocation7_spill] sm:$0xff] %v2545_v12  ;;  %v1175_v38 = vmax.f32 %v1174_v14, %v1112_v21  ;;  %v2547_v36 = vpop.f32.mrf.mxu3  ;;  %v1603_v14 = vld [vmem:[%s2917_s0 + $0xd0] sm:$0xf] }
  0xe9   :  { %2928 = vst [vmem:[#allocation8_spill] sm:$0xff] %v2547_v36  ;;  %v449_v17 = vpop.f32.mrf.mxu0  ;;  %v536_v16 = vpop.f32.mrf.mxu1 }
  0xea   :  { %v529_v33 = vadd.f32 %v528_v50, %v449_v17  ;;  %v1894_v50 = vld [vmem:[%s2917_s0 + $0xd4] sm:$0xf0] }
  0xeb   :  { %v2569_v17 = vor.u32 %v1894_v50, %v1603_v14 }
  0xec   :  { %v1031_v45 = vadd.f32 %v932_v49, %v529_v33  ;;  %629 = vmatmul.bf16.gmra.mxu2 %v2461_v15  ;;  %767 = vmatmul.bf16.gmra.mxu1 %v2369_v26  ;;  %v1932_v49 = vld [vmem:[%s2919_s3 + $0x38] sm:$0xff] }
  0xed   :  { %1762 = vmatmul.msk.bf16.gmra.mxu3 %vm375_vm0, %v2059_v31  ;;  %v935_v31 = vperm.slane %v2556_v22, 0  ;;  %1449 = vmatpush.bf16.msra.mxu2 %v1932_v49 }
  0xee   :  { %v1115_v21 = vmax.f32 %v1031_v45, 0.0 }
  0xef   :  { %v2564_v18 = vpop.f32.mrf.mxu2 }
  0xf0   :  { %v1214_v26 = vmax.f32 %v1213_v23, %v1115_v21  ;;  %v2566_v6 = vpop.f32.mrf.mxu3 }
  0xf1   :  { %2929 = vst [vmem:[#allocation9_spill] sm:$0xff] %v2566_v6  ;;  %v452_v2 = vpop.f32.mrf.mxu0  ;;  %v538_v24 = vpop.f32.mrf.mxu1 }
  0xf2   :  { %v532_v20 = vadd.f32 %v531_v3, %v452_v2  ;;  %v2586_v3 = vld [vmem:[%s2918_s2 + $0x12] sm:$0x7] }
  0xf4   :  { %v1034_v33 = vadd.f32 %v935_v31, %v532_v20  ;;  %491 = vmatmul.bf16.gmra.mxu0 %v2569_v17 }
  0xf6   :  { %v1118_v45 = vmax.f32 %v1034_v33, 0.0 }
  0xf7   :  { %v2575_v12 = vpop.f32.mrf.mxu2 }
  0xf8   :  { %2930 = vst [vmem:[#allocation10_spill] sm:$0xff] %v2575_v12  ;;  %v1176_v23 = vmax.f32 %v1175_v38, %v1118_v45  ;;  %v2577_v21 = vpop.f32.mrf.mxu3 }
  0xf9   :  { %2931 = vst [vmem:[#allocation11_spill] sm:$0xff] %v2577_v21  ;;  %v454_v36 = vpop.f32.mrf.mxu0  ;;  %v541_v14 = vpop.f32.mrf.mxu1 }
  0xfa   :  { %v534_v50 = vadd.f32 %v533_v7, %v454_v36  ;;  %v938_v7 = vperm.slane %v2586_v3, 0 }
  0xfc   :  { %v1037_v6 = vadd.f32 %v935_v31, %v534_v50  ;;  %634 = vmatmul.bf16.gmra.mxu2 %v2488_v58  ;;  %772 = vmatmul.bf16.gmra.mxu1 %v2389_v37 }
  0xfd   :  { %1763 = vmatmul.msk.bf16.gmra.mxu3 %vm375_vm0, %v2132_v61 }
  0xfe   :  { %v1121_v49 = vmax.f32 %v1037_v6, 0.0 }
  0xff   :  { %v2588_v38 = vpop.f32.mrf.mxu2 }
 0x100   :  { %v1215_v2 = vmax.f32 %v1214_v26, %v1121_v49  ;;  %v2590_v20 = vpop.f32.mrf.mxu3  ;;  %v1931_v26 = vld [vmem:[%s2919_s3 + $0x30] sm:$0xff] }
 0x101   :  { %2932 = vst [vmem:[#allocation12_spill] sm:$0xff] %v2590_v20  ;;  %v457_v36 = vpop.f32.mrf.mxu0  ;;  %v543_v31 = vpop.f32.mrf.mxu1  ;;  %1450 = vmatpush.bf16.msra.mxu2 %v1931_v26 }
 0x102   :  { %v537_v33 = vadd.f32 %v536_v16, %v457_v36 }
 0x104   :  { %v1040_v37 = vadd.f32 %v938_v7, %v537_v33  ;;  %1743 = vmatmul.msk.bf16.vlgmr.msrb.gmra.mxu0 %vm375_vm0, %v2052_v27  ;;  %v2609_v27 = vld [vmem:[%s2918_s2 + $0x15] sm:$0x7] }
 0x106   :  { %v1124_v61 = vmax.f32 %v1040_v37, 0.0 }
 0x107   :  { %v2595_v45 = vpop.f32.mrf.mxu2 }
 0x108   :  { %2933 = vst [vmem:[#allocation13_spill] sm:$0xff] %v2595_v45  ;;  %v1177_v50 = vmax.f32 %v1176_v23, %v1124_v61  ;;  %v2597_v21 = vpop.f32.mrf.mxu3 }
 0x109   :  { %2934 = vst [vmem:[#allocation14_spill] sm:$0xff] %v2597_v21  ;;  %v459_v6 = vpop.f32.mrf.mxu0  ;;  %v546_v49 = vpop.f32.mrf.mxu1 }
 0x10a   :  { %v539_v12 = vadd.f32 %v538_v24, %v459_v6 }
 0x10c   :  { %v1043_v20 = vadd.f32 %v938_v7, %v539_v12  ;;  %639 = vmatmul.bf16.gmra.mxu2 %v2515_v48  ;;  %777 = vmatmul.bf16.gmra.mxu1 %v2407_v44  ;;  %v941_v12 = vperm.slane %v2609_v27, 0 }
 0x10d   :  { %1764 = vmatmul.msk.bf16.gmra.mxu3 %vm375_vm0, %v2209_v32 }
 0x10e   :  { %v1127_v16 = vmax.f32 %v1043_v20, 0.0 }
 0x10f   :  { %v2611_v23 = vpop.f32.mrf.mxu2 }
 0x110   :  { %v1216_v36 = vmax.f32 %v1215_v2, %v1127_v16  ;;  %v2613_v33 = vpop.f32.mrf.mxu3 }
 0x111   :  { %2935 = vst [vmem:[#allocation15_spill] sm:$0xff] %v2613_v33  ;;  %v462_v24 = vpop.f32.mrf.mxu0  ;;  %v548_v7 = vpop.f32.mrf.mxu1 }
 0x112   :  { %v542_v37 = vadd.f32 %v541_v14, %v462_v24 }
 0x114   :  { %v1046_v44 = vadd.f32 %v941_v12, %v542_v37  ;;  %1744 = vmatmul.msk.bf16.gmra.mxu0 %vm375_vm0, %v2128_v59  ;;  %v2629_v59 = vld [vmem:[%s2918_s2 + $0x18] sm:$0x7] }
 0x116   :  { %v1130_v32 = vmax.f32 %v1046_v44, 0.0 }
 0x117   :  { %v2618_v61 = vpop.f32.mrf.mxu2 }
 0x118   :  { %2936 = vst [vmem:[#allocation16_spill] sm:$0xff] %v2618_v61  ;;  %v1178_v26 = vmax.f32 %v1177_v50, %v1130_v32  ;;  %v2620_v6 = vpop.f32.mrf.mxu3 }
 0x119   :  { %2937 = vst [vmem:[#allocation17_spill] sm:$0xff] %v2620_v6  ;;  %v464_v20 = vpop.f32.mrf.mxu0  ;;  %v743_v21 = vpop.f32.mrf.mxu1 }
 0x11a   :  { %v544_v2 = vadd.f32 %v543_v31, %v464_v20  ;;  %v944_v31 = vperm.slane %v2629_v59, 0 }
 0x11c   :  { %v1049_v16 = vadd.f32 %v941_v12, %v544_v2  ;;  %644 = vmatmul.bf16.gmra.mxu2 %v2542_v11  ;;  %782 = vmatmul.bf16.gmra.mxu1 %v2428_v53 }
 0x11d   :  { %1765 = vmatmul.msk.bf16.gmra.mxu3 %vm375_vm0, %v2284_v0 }
 0x11e   :  { %v1133_v14 = vmax.f32 %v1049_v16, 0.0 }
 0x11f   :  { %v2631_v50 = vpop.f32.mrf.mxu2 }
 0x120   :  { %2938 = vst [vmem:[#allocation18_spill] sm:$0xff] %v2631_v50  ;;  %v1217_v24 = vmax.f32 %v1216_v36, %v1133_v14  ;;  %v822_v37 = vpop.f32.mrf.mxu3  ;;  %v1930_v36 = vld [vmem:[%s2919_s3 + $0x28] sm:$0xff] }
 0x121   :  { %v823_v12 = vadd.f32 %v822_v37, %v743_v21  ;;  %v467_v44 = vpop.f32.mrf.mxu0  ;;  %v745_v32 = vpop.f32.mrf.mxu1  ;;  %1451 = vmatpush.bf16.msra.mxu2 %v1930_v36 }
 0x122   :  { %v547_v20 = vadd.f32 %v546_v49, %v467_v44  ;;  %v2649_v49 = vld [vmem:[%s2918_s2 + $0x1b] sm:$0x7] }
 0x124   :  { %v1052_v53 = vadd.f32 %v944_v31, %v547_v20  ;;  %1745 = vmatmul.msk.bf16.gmra.mxu0 %vm375_vm0, %v2205_v29  ;;  %v922_v29 = vperm.slane %v2438_v4, 2 }
 0x126   :  { %v1136_v0 = vmax.f32 %v1052_v53, 0.0 }
 0x127   :  { %v2636_v2 = vpop.f32.mrf.mxu2 }
 0x128   :  { %2939 = vst [vmem:[#allocation19_spill] sm:$0xff] %v2636_v2  ;;  %v1179_v6 = vmax.f32 %v1178_v26, %v1136_v0  ;;  %v824_v61 = vpop.f32.mrf.mxu3 }
 0x129   :  { %v825_v16 = vadd.f32 %v824_v61, %v745_v32  ;;  %v469_v14 = vpop.f32.mrf.mxu0  ;;  %v748_v50 = vpop.f32.mrf.mxu1  ;;  %v947_v32 = vperm.slane %v2649_v49, 0 }
 0x12a   :  { %v549_v21 = vadd.f32 %v548_v7, %v469_v14  ;;  %v925_v7 = vperm.slane %v2447_v5, 2 }
 0x12c   :  { %v1055_v37 = vadd.f32 %v944_v31, %v549_v21  ;;  %649 = vmatmul.bf16.gmra.mxu2 %v2569_v17  ;;  %787 = vmatmul.bf16.gmra.mxu1 %v2461_v15  ;;  %v1006_v15 = vadd.f32 %v922_v29, %v823_v12 }
 0x12d   :  { %1766 = vmatmul.msk.bf16.gmra.mxu3 %vm375_vm0, %v2054_v28 }
 0x12e   :  { %v1139_v61 = vmax.f32 %v1055_v37, 0.0  ;;  %v1090_v21 = vmax.f32 %v1006_v15, 0.0 }
 0x12f   :  { %v610_v26 = vpop.f32.mrf.mxu2 }
 0x130   :  { %v2652_v44 = vmax.f32 %v1217_v24, %v1139_v61  ;;  %v827_v31 = vpop.f32.mrf.mxu3 }
 0x131   :  { %v828_v20 = vadd.f32 %v827_v31, %v748_v50  ;;  %v472_v53 = vpop.f32.mrf.mxu0  ;;  %v750_v0 = vpop.f32.mrf.mxu1  ;;  %v1009_v50 = vadd.f32 %v922_v29, %v825_v16  ;;  %v928_v29 = vperm.slane %v2475_v41, 2 }
 0x132   :  { %v552_v28 = vadd.f32 %v2403_v42, %v472_v53  ;;  %v690_v53 = vadd.f32 %v2405_v43, %v610_v26  ;;  %v1929_v43 = vld [vmem:[%s2919_s3 + $0x20] sm:$0xff] }
 0x133   :  { %v1012_v36 = vadd.f32 %v925_v7, %v828_v20  ;;  %1452 = vmatpush.bf16.msra.mxu2 %v1929_v43 }
 0x134   :  { %v1058_v14 = vadd.f32 %v947_v32, %v552_v28  ;;  %1746 = vmatmul.msk.bf16.gmra.mxu0 %vm375_vm0, %v2280_v62  ;;  %v936_v28 = vperm.slane %v2556_v22, 1  ;;  %v1093_v62 = vmax.f32 %v1009_v50, 0.0 }
 0x135   :  { %v1096_v37 = vmax.f32 %v1012_v36, 0.0 }
 0x136   :  { %v1142_v24 = vmax.f32 %v1058_v14, 0.0 }
 0x137   :  { %v1198_v61 = vmax.f32 %v1090_v21, %v1096_v37  ;;  %v612_v2 = vpop.f32.mrf.mxu2 }
 0x138   :  { %v2660_v45 = vmax.f32 %v1179_v6, %v1142_v24  ;;  %v829_v12 = vpop.f32.mrf.mxu3  ;;  %v939_v6 = vperm.slane %v2586_v3, 1 }
 0x139   :  { %v830_v31 = vadd.f32 %v829_v12, %v750_v0  ;;  %v2662_v33 = vpop.f32.mrf.mxu0  ;;  %v753_v42 = vpop.f32.mrf.mxu1  ;;  %v1035_v0 = vadd.f32 %v936_v28, %v690_v53  ;;  %v692_v12 = vadd.f32 %v2412_v47, %v612_v2 }
 0x13b   :  { %v1015_v20 = vadd.f32 %v925_v7, %v830_v31  ;;  %v1119_v24 = vmax.f32 %v1035_v0, 0.0 }
 0x13c   :  { %792 = vmatmul.bf16.gmra.mxu1 %v2488_v58 }
 0x13d   :  { %v1099_v15 = vmax.f32 %v1015_v20, 0.0  ;;  %1767 = vmatmul.msk.bf16.gmra.mxu3 %vm375_vm0, %v2130_v60 }
 0x13f   :  { %v1237_v36 = vmax.f32 %v1093_v62, %v1099_v15  ;;  %v615_v16 = vpop.f32.mrf.mxu2  ;;  %v1038_v62 = vadd.f32 %v936_v28, %v692_v12 }
 0x140   :  { %v695_v7 = vadd.f32 %v2426_v52, %v615_v16  ;;  %v832_v14 = vpop.f32.mrf.mxu3 }
 0x141   :  { %v833_v58 = vadd.f32 %v832_v14, %v753_v42  ;;  %v2675_v26 = vpop.f32.mrf.mxu0  ;;  %v755_v21 = vpop.f32.mrf.mxu1 }
 0x142   :  { %v1041_v37 = vadd.f32 %v939_v6, %v695_v7 }
 0x143   :  { %v1018_v60 = vadd.f32 %v928_v29, %v833_v58  ;;  %v1122_v58 = vmax.f32 %v1038_v62, 0.0 }
 0x144   :  { %v1125_v50 = vmax.f32 %v1041_v37, 0.0  ;;  %1747 = vmatmul.msk.bf16.gmra.mxu0 %vm375_vm0, %v2313_v9 }
 0x145   :  { %v1102_v52 = vmax.f32 %v1018_v60, 0.0 }
 0x146   :  { %v1189_v31 = vmax.f32 %v1125_v50, %v1119_v24 }
 0x147   :  { %v1199_v20 = vmax.f32 %v1198_v61, %v1102_v52  ;;  %v617_v53 = vpop.f32.mrf.mxu2  ;;  %v942_v61 = vperm.slane %v2609_v27, 1 }
 0x148   :  { %v697_v42 = vadd.f32 %v2433_v57, %v617_v53  ;;  %v834_v15 = vpop.f32.mrf.mxu3 }
 0x149   :  { %v835_v16 = vadd.f32 %v834_v15, %v755_v21  ;;  %v2681_v14 = vpop.f32.mrf.mxu0  ;;  %v758_v7 = vpop.f32.mrf.mxu1  ;;  %v931_v21 = vperm.slane %v2502_v1, 2  ;;  %v1927_v15 = vld [vmem:[%s2919_s3 + $0x10] sm:$0xff] }
 0x14a   :  { %v1044_v43 = vadd.f32 %v939_v6, %v697_v42 }
 0x14b   :  { %v1021_v0 = vadd.f32 %v928_v29, %v835_v16 }
 0x14c   :  { %v1128_v47 = vmax.f32 %v1044_v43, 0.0  ;;  %797 = vmatmul.bf16.gmra.mxu1 %v2515_v48 }
 0x14d   :  { %v1105_v2 = vmax.f32 %v1021_v0, 0.0  ;;  %1768 = vmatmul.msk.bf16.gmra.mxu3 %vm375_vm0, %v2207_v30  ;;  %v1928_v30 = vld [vmem:[%s2919_s3 + $0x18] sm:$0xff] }
 0x14e   :  { %v1228_v9 = vmax.f32 %v1128_v47, %v1122_v58  ;;  %1453 = vmatpush.bf16.msra.mxu2 %v1928_v30 }
 0x14f   :  { %v1238_v28 = vmax.f32 %v1237_v36, %v1105_v2  ;;  %v620_v57 = vpop.f32.mrf.mxu2  ;;  %v945_v2 = vperm.slane %v2629_v59, 1 }
 0x150   :  { %v700_v37 = vadd.f32 %v2458_v40, %v620_v57  ;;  %v837_v60 = vpop.f32.mrf.mxu3 }
 0x151   :  { %v838_v6 = vadd.f32 %v837_v60, %v758_v7  ;;  %v2689_v29 = vpop.f32.mrf.mxu0  ;;  %v760_v24 = vpop.f32.mrf.mxu1 }
 0x152   :  { %v1047_v12 = vadd.f32 %v942_v61, %v700_v37  ;;  %1454 = vmatpush.bf16.msra.mxu2 %v1927_v15 }
 0x153   :  { %v1024_v48 = vadd.f32 %v931_v21, %v838_v6 }
 0x154   :  { %v1131_v50 = vmax.f32 %v1047_v12, 0.0 }
 0x155   :  { %v1108_v52 = vmax.f32 %v1024_v48, 0.0 }
 0x156   :  { %v1190_v53 = vmax.f32 %v1189_v31, %v1131_v50  ;;  %v1926_v31 = vld [vmem:[%s2919_s3 + $0x8] sm:$0xff] }
 0x157   :  { %v1200_v36 = vmax.f32 %v1199_v20, %v1108_v52  ;;  %v622_v62 = vpop.f32.mrf.mxu2  ;;  %1455 = vmatpush.bf16.msra.mxu2 %v1926_v31 }
 0x158   :  { %v702_v42 = vadd.f32 %v2466_v34, %v622_v62  ;;  %v839_v40 = vpop.f32.mrf.mxu3 }
 0x159   :  { %v840_v16 = vadd.f32 %v839_v40, %v760_v24  ;;  %v484_v7 = vpop.f32.mrf.mxu0  ;;  %v763_v43 = vpop.f32.mrf.mxu1 }
 0x15a   :  { %v1050_v0 = vadd.f32 %v942_v61, %v702_v42  ;;  %v934_v61 = vperm.slane %v2529_v35, 2 }
 0x15b   :  { %v1027_v58 = vadd.f32 %v931_v21, %v840_v16  ;;  %v2714_v16 = vld [vmem:[%s2918_s2 + $0x1e] sm:$0x7] }
 0x15c   :  { %v1134_v47 = vmax.f32 %v1050_v0, 0.0  ;;  %802 = vmatmul.bf16.gmra.mxu1 %v2542_v11  ;;  %v1925_v11 = vld [vmem:[%s2919_s3] sm:$0xff]  ;;  %v554_v0 = vadd.f32 %v2410_v46, %v2662_v33  ;;  %v559_v46 = vadd.f32 %v2431_v56, %v2681_v14  ;;  %v948_v33 = vperm.slane %v2649_v49, 1 }
 0x15d   :  { %v1111_v20 = vmax.f32 %v1027_v58, 0.0  ;;  %1769 = vmatmul.msk.bf16.gmra.mxu3 %vm375_vm0, %v2282_v63  ;;  %1456 = vmatpush.bf16.msra.mxu2 %v1925_v11  ;;  %v564_v14 = vadd.f32 %v2464_v25, %v484_v7 }
 0x15e   :  { %v1229_v34 = vmax.f32 %v1228_v9, %v1134_v47 }
 0x15f   :  { %v1239_v57 = vmax.f32 %v1238_v28, %v1111_v20  ;;  %v625_v37 = vpop.f32.mrf.mxu2 }
 0x160   :  { %v705_v21 = vadd.f32 %v2485_v55, %v625_v37  ;;  %v842_v60 = vpop.f32.mrf.mxu3  ;;  %v937_v37 = vperm.slane %v2556_v22, 2 }
 0x161   :  { %v843_v6 = vadd.f32 %v842_v60, %v763_v43  ;;  %v487_v24 = vpop.f32.mrf.mxu0  ;;  %v765_v12 = vpop.f32.mrf.mxu1 }
 0x162   :  { %v1053_v48 = vadd.f32 %v945_v2, %v705_v21  ;;  %v2750_v21 = vld [vmem:[%s2918_s2 + $0x27] sm:$0x7] }
 0x163   :  { %v1030_v63 = vadd.f32 %v934_v61, %v843_v6 }
 0x164   :  { %v1137_v9 = vmax.f32 %v1053_v48, 0.0 }
 0x165   :  { %v1114_v50 = vmax.f32 %v1030_v63, 0.0 }
 0x166   :  { %v1191_v30 = vmax.f32 %v1190_v53, %v1137_v9  ;;  %v950_v53 = vperm.slane %v2714_v16, 0 }
 0x167   :  { %v1201_v28 = vmax.f32 %v1200_v36, %v1114_v50  ;;  %v627_v52 = vpop.f32.mrf.mxu2  ;;  %v2725_v36 = vld [vmem:[%s2918_s2 + $0x21] sm:$0x7] }
 0x168   :  { %v707_v62 = vadd.f32 %v2493_v19, %v627_v52  ;;  %v844_v42 = vpop.f32.mrf.mxu3  ;;  %v557_v19 = vadd.f32 %v2424_v51, %v2675_v26  ;;  %v1061_v26 = vadd.f32 %v947_v32, %v554_v0  ;;  %v953_v56 = vperm.slane %v2725_v36, 0  ;;  %v2940_v50 = vld [vmem:[#allocation2_spill] sm:$0xff] }
 0x169   :  { %v845_v55 = vadd.f32 %v844_v42, %v765_v12  ;;  %v489_v40 = vpop.f32.mrf.mxu0  ;;  %v768_v15 = vpop.f32.mrf.mxu1  ;;  %v1067_v6 = vadd.f32 %v950_v53, %v559_v46  ;;  %v959_v12 = vperm.slane %v2750_v21, 0 }
 0x16a   :  { %v1056_v43 = vadd.f32 %v945_v2, %v707_v62  ;;  %v1064_v32 = vadd.f32 %v950_v53, %v557_v19  ;;  %v1073_v63 = vadd.f32 %v953_v56, %v564_v14  ;;  %v2941_v14 = vld [vmem:[#allocation3_spill] sm:$0xff] }
 0x16b   :  { %v1033_v58 = vadd.f32 %v934_v61, %v845_v55  ;;  %v1151_v55 = vmax.f32 %v1067_v6, 0.0 }
 0x16c   :  { %v1140_v47 = vmax.f32 %v1056_v43, 0.0  ;;  %807 = vmatmul.bf16.gmra.mxu1 %v2569_v17  ;;  %v2734_v17 = vld [vmem:[%s2918_s2 + $0x24] sm:$0x7]  ;;  %v1148_v62 = vmax.f32 %v1064_v32, 0.0 }
 0x16d   :  { %v1117_v31 = vmax.f32 %v1033_v58, 0.0  ;;  %1770 = vmatmul.msk.bf16.gmra.mxu3 %vm375_vm0, %v2315_v10  ;;  %v562_v10 = vadd.f32 %v2456_v13, %v2689_v29  ;;  %v567_v13 = vadd.f32 %v2483_v54, %v487_v24  ;;  %v569_v29 = vadd.f32 %v2491_v8, %v489_v40 }
 0x16e   :  { %v2736_v51 = vmax.f32 %v1229_v34, %v1140_v47  ;;  %v1157_v58 = vmax.f32 %v1073_v63, 0.0  ;;  %v1181_v53 = vmax.f32 %v2660_v45, %v1148_v62  ;;  %v940_v45 = vperm.slane %v2586_v3, 2 }
 0x16f   :  { %v1240_v20 = vmax.f32 %v1239_v57, %v1117_v31  ;;  %v630_v2 = vpop.f32.mrf.mxu2  ;;  %v956_v57 = vperm.slane %v2734_v17, 0  ;;  %v1070_v48 = vadd.f32 %v953_v56, %v562_v10 }
 0x170   :  { %v710_v61 = vadd.f32 %v2512_v39, %v630_v2  ;;  %v847_v34 = vpop.f32.mrf.mxu3  ;;  %v1145_v39 = vmax.f32 %v1061_v26, 0.0 }
 0x171   :  { %v848_v60 = vadd.f32 %v847_v34, %v768_v15  ;;  %v492_v22 = vpop.f32.mrf.mxu0  ;;  %v770_v11 = vpop.f32.mrf.mxu1  ;;  %v1076_v15 = vadd.f32 %v956_v57, %v567_v13  ;;  %v1079_v43 = vadd.f32 %v956_v57, %v569_v29  ;;  %v1154_v0 = vmax.f32 %v1070_v48, 0.0 }
 0x172   :  { %v1059_v25 = vadd.f32 %v948_v33, %v710_v61  ;;  %v572_v52 = vadd.f32 %v2940_v50, %v492_v22  ;;  %v1219_v40 = vmax.f32 %v2652_v44, %v1145_v39 }
 0x173   :  { %v1036_v7 = vadd.f32 %v937_v37, %v848_v60  ;;  %v1160_v10 = vmax.f32 %v1076_v15, 0.0  ;;  %v1163_v56 = vmax.f32 %v1079_v43, 0.0 }
 0x174   :  { %v1143_v9 = vmax.f32 %v1059_v25, 0.0  ;;  %v1082_v47 = vadd.f32 %v959_v12, %v572_v52  ;;  %v1220_v2 = vmax.f32 %v1219_v40, %v1151_v55 }
 0x175   :  { %v1120_v42 = vmax.f32 %v1036_v7, 0.0 }
 0x176   :  { %v2759_v54 = vmax.f32 %v1191_v30, %v1143_v9  ;;  %v1221_v34 = vmax.f32 %v1220_v2, %v1157_v58  ;;  %v1166_v32 = vmax.f32 %v1082_v47, 0.0 }
 0x177   :  { %v1202_v8 = vmax.f32 %v1201_v28, %v1120_v42  ;;  %v2761_v24 = vpop.f32.mrf.mxu2  ;;  %v1182_v28 = vmax.f32 %v1181_v53, %v1154_v0  ;;  %v943_v0 = vperm.slane %v2609_v27, 2 }
 0x178   :  { %v849_v19 = vpop.f32.mrf.mxu3  ;;  %v1222_v22 = vmax.f32 %v1221_v34, %v1163_v56  ;;  %v1948_v56 = vld [vmem:[%s2919_s3 + $0xb8] sm:$0xff] }
 0x179   :  { %v850_v31 = vadd.f32 %v849_v19, %v770_v11  ;;  %v494_v46 = vpop.f32.mrf.mxu0  ;;  %v773_v26 = vpop.f32.mrf.mxu1  ;;  %v1183_v60 = vmax.f32 %v1182_v28, %v1160_v10  ;;  %1477 = vmatpush.bf16.msra.mxu0 %v1948_v56 }
 0x17a   :  { %v574_v30 = vadd.f32 %v2941_v14, %v494_v46  ;;  %v1940_v46 = vld [vmem:[%s2919_s3 + $0x78] sm:$0xff] }
 0x17b   :  { %v1039_v61 = vadd.f32 %v937_v37, %v850_v31  ;;  %v1184_v11 = vmax.f32 %v1183_v60, %v1166_v32  ;;  %1463 = vmatpush.bf16.msrb.mxu2 %v1940_v46  ;;  %v1938_v32 = vld [vmem:[%s2919_s3 + $0x68] sm:$0xff]  ;;  %v1933_v46 = vld [vmem:[%s2919_s3 + $0x40] sm:$0xff] }
 0x17c   :  { %v1085_v57 = vadd.f32 %v959_v12, %v574_v30 }
 0x17d   :  { %v1123_v44 = vmax.f32 %v1039_v61, 0.0  ;;  %v1939_v61 = vld [vmem:[%s2919_s3 + $0x70] sm:$0xff] }
 0x17e   :  { %v1169_v6 = vmax.f32 %v1085_v57, 0.0 }
 0x17f   :  { %v1241_v13 = vmax.f32 %v1240_v20, %v1123_v44  ;;  %v2766_v29 = vpop.f32.mrf.mxu2  ;;  %1464 = vmatpush.bf16.msrb.mxu2 %v1939_v61  ;;  %v946_v44 = vperm.slane %v2629_v59, 2  ;;  %v1936_v59 = vld [vmem:[%s2919_s3 + $0x58] sm:$0xff]  ;;  %v924_v61 = vperm.slane %v2447_v5, 1 }
 0x180   :  { %v1223_v25 = vmax.f32 %v1222_v22, %v1169_v6  ;;  %v852_v39 = vpop.f32.mrf.mxu3  ;;  %v1947_v22 = vld [vmem:[%s2919_s3 + $0xb0] sm:$0xff] }
 0x181   :  { %v853_v7 = vadd.f32 %v852_v39, %v773_v26  ;;  %v2769_v48 = vpop.f32.mrf.mxu0  ;;  %v775_v37 = vpop.f32.mrf.mxu1  ;;  %1478 = vmatpush.bf16.msra.mxu0 %v1947_v22  ;;  %v954_v22 = vperm.slane %v2725_v36, 1 }
 0x182   :  { %v1250_v63 = vpack.c.bf16 %v1223_v25, %v1184_v11  ;;  %v1937_v25 = vld [vmem:[%s2919_s3 + $0x60] sm:$0xff] }
 0x183   :  { %v1042_v9 = vadd.f32 %v940_v45, %v853_v7  ;;  %1465 = vmatpush.bf16.msrb.mxu2 %v1938_v32 }
 0x184   :  { %1457 = vmatmul.bf16.vlgmr.msra.gmra.mxu2 %v1250_v63 }
 0x185   :  { %v1126_v12 = vmax.f32 %v1042_v9, 0.0 }
 0x187   :  { %v1203_v50 = vmax.f32 %v1202_v8, %v1126_v12  ;;  %v2771_v52 = vpop.f32.mrf.mxu2  ;;  %1466 = vmatpush.bf16.msrb.mxu2 %v1937_v25 }
 0x188   :  { %v854_v62 = vpop.f32.mrf.mxu3 }
 0x189   :  { %v855_v20 = vadd.f32 %v854_v62, %v775_v37  ;;  %v2773_v42 = vpop.f32.mrf.mxu0  ;;  %v778_v55 = vpop.f32.mrf.mxu1  ;;  %v1946_v62 = vld [vmem:[%s2919_s3 + $0xa8] sm:$0xff] }
 0x18a   :  { %1479 = vmatpush.bf16.msra.mxu0 %v1946_v62 }
 0x18b   :  { %v1045_v3 = vadd.f32 %v940_v45, %v855_v20  ;;  %1467 = vmatpush.bf16.msrb.mxu2 %v1936_v59  ;;  %v1935_v20 = vld [vmem:[%s2919_s3 + $0x50] sm:$0xff]  ;;  %v957_v59 = vperm.slane %v2734_v17, 1 }
 0x18d   :  { %v1129_v15 = vmax.f32 %v1045_v3, 0.0 }
 0x18f   :  { %v1242_v43 = vmax.f32 %v1241_v13, %v1129_v15  ;;  %v2775_v40 = vpop.f32.mrf.mxu2  ;;  %1468 = vmatpush.bf16.msrb.mxu2 %v1935_v20  ;;  %v2947_v20 = vld [vmem:[#allocation15_spill] sm:$0xff] }
 0x190   :  { %v857_v58 = vpop.f32.mrf.mxu3 }
 0x191   :  { %v858_v47 = vadd.f32 %v857_v58, %v778_v55  ;;  %v669_v19 = vpop.f32.mrf.mxu0  ;;  %v780_v53 = vpop.f32.mrf.mxu1  ;;  %v949_v58 = vperm.slane %v2649_v49, 2 }
 0x193   :  { %v1048_v31 = vadd.f32 %v943_v0, %v858_v47 }
 0x195   :  { %v1132_v8 = vmax.f32 %v1048_v31, 0.0 }
 0x197   :  { %v1204_v26 = vmax.f32 %v1203_v50, %v1132_v8  ;;  %v2781_v2 = vpop.f32.mrf.mxu2 }
 0x198   :  { %v859_v10 = vpop.f32.mrf.mxu3 }
 0x199   :  { %v860_v27 = vadd.f32 %v859_v10, %v780_v53  ;;  %v2786_v14 = vpop.f32.mrf.mxu0  ;;  %v783_v30 = vpop.f32.mrf.mxu1  ;;  %v2942_v10 = vld [vmem:[#allocation6_spill] sm:$0xff] }
 0x19a   :  { %v715_v56 = vadd.f32 %v2942_v10, %v2766_v29  ;;  %v2945_v29 = vld [vmem:[#allocation9_spill] sm:$0xff] }
 0x19b   :  { %v1051_v28 = vadd.f32 %v943_v0, %v860_v27  ;;  %v951_v27 = vperm.slane %v2714_v16, 1 }
 0x19d   :  { %v1135_v34 = vmax.f32 %v1051_v28, 0.0 }
 0x19f   :  { %v1243_v57 = vmax.f32 %v1242_v43, %v1135_v34  ;;  %v645_v11 = vpop.f32.mrf.mxu2  ;;  %v1934_v43 = vld [vmem:[%s2919_s3 + $0x48] sm:$0xff]  ;;  %v2943_v34 = vld [vmem:[#allocation4_spill] sm:$0xff] }
 0x1a0   :  { %v862_v60 = vpop.f32.mrf.mxu3  ;;  %1469 = vmatpush.bf16.msrb.mxu2 %v1934_v43  ;;  %v712_v32 = vadd.f32 %v2943_v34, %v2761_v24  ;;  %v1945_v24 = vld [vmem:[%s2919_s3 + $0xa0] sm:$0xff] }
 0x1a1   :  { %v863_v6 = vadd.f32 %v862_v60, %v783_v30  ;;  %v674_v13 = vpop.f32.mrf.mxu0  ;;  %v785_v45 = vpop.f32.mrf.mxu1  ;;  %v670_v30 = vadd.f32 %v669_v19, %v2564_v18  ;;  %v921_v60 = vperm.slane %v2438_v4, 1  ;;  %v927_v18 = vperm.slane %v2475_v41, 1  ;;  %1480 = vmatpush.bf16.msra.mxu0 %v1945_v24 }
 0x1a2   :  { %v675_v25 = vadd.f32 %v674_v13, %v2588_v38  ;;  %v1065_v19 = vadd.f32 %v951_v27, %v715_v56  ;;  %v1062_v41 = vadd.f32 %v948_v33, %v712_v32 }
 0x1a3   :  { %v1054_v39 = vadd.f32 %v946_v44, %v863_v6  ;;  %v1011_v4 = vadd.f32 %v924_v61, %v670_v30  ;;  %v2951_v30 = vld [vmem:[#allocation11_spill] sm:$0xff] }
 0x1a4   :  { %1470 = vmatpush.bf16.msrb.mxu2 %v1933_v46  ;;  %v1149_v62 = vmax.f32 %v1065_v19, 0.0 }
 0x1a5   :  { %v1138_v7 = vmax.f32 %v1054_v39, 0.0  ;;  %v2946_v39 = vld [vmem:[#allocation12_spill] sm:$0xff] }
 0x1a6   :  { %v1193_v32 = vmax.f32 %v2759_v54, %v1149_v62 }
 0x1a7   :  { %v1205_v37 = vmax.f32 %v1204_v26, %v1138_v7  ;;  %v2812_v3 = vpop.f32.mrf.mxu2  ;;  %v725_v7 = vadd.f32 %v2946_v39, %v645_v11  ;;  %v960_v11 = vperm.slane %v2750_v21, 1  ;;  %v2953_v39 = vld [vmem:[#allocation14_spill] sm:$0xff] }
 0x1a8   :  { %v864_v63 = vpop.f32.mrf.mxu3  ;;  %v727_v54 = vadd.f32 %v2953_v39, %v2812_v3 }
 0x1a9   :  { %v865_v9 = vadd.f32 %v864_v63, %v785_v45  ;;  %v2804_v12 = vpop.f32.mrf.mxu0  ;;  %v788_v50 = vpop.f32.mrf.mxu1  ;;  %v720_v45 = vadd.f32 %v2945_v29, %v2775_v40  ;;  %v1077_v33 = vadd.f32 %v957_v59, %v725_v7 }
 0x1ab   :  { %v1057_v55 = vadd.f32 %v946_v44, %v865_v9  ;;  %v1071_v9 = vadd.f32 %v954_v22, %v720_v45 }
 0x1ad   :  { %v1141_v15 = vmax.f32 %v1057_v55, 0.0  ;;  %v1155_v56 = vmax.f32 %v1071_v9, 0.0 }
 0x1af   :  { %v2817_v0 = vmax.f32 %v1243_v57, %v1141_v15  ;;  %v2944_v57 = vld [vmem:[#allocation5_spill] sm:$0xff]  ;;  %v650_v6 = vpop.f32.mrf.mxu2  ;;  %v2948_v15 = vld [vmem:[#allocation8_spill] sm:$0xff] }
 0x1b0   :  { %v867_v47 = vpop.f32.mrf.mxu3  ;;  %v665_v44 = vadd.f32 %v2769_v48, %v2944_v57  ;;  %v730_v55 = vadd.f32 %v2947_v20, %v650_v6  ;;  %v717_v43 = vadd.f32 %v2948_v15, %v2771_v52  ;;  %v1944_v52 = vld [vmem:[%s2919_s3 + $0x98] sm:$0xff] }
 0x1b1   :  { %v868_v53 = vadd.f32 %v867_v47, %v788_v50  ;;  %v679_v31 = vpop.f32.mrf.mxu0  ;;  %v2820_v8 = vpop.f32.mrf.mxu1  ;;  %v1017_v50 = vadd.f32 %v927_v18, %v675_v25  ;;  %v1095_v47 = vmax.f32 %v1011_v4, 0.0  ;;  %v2952_v57 = vld [vmem:[#allocation13_spill] sm:$0xff]  ;;  %1481 = vmatpush.bf16.msra.mxu0 %v1944_v52 }
 0x1b2   :  { %v1005_v38 = vadd.f32 %v921_v60, %v665_v44  ;;  %v680_v13 = vadd.f32 %v679_v31, %v2611_v23  ;;  %v2950_v31 = vld [vmem:[#allocation7_spill] sm:$0xff]  ;;  %v1083_v44 = vadd.f32 %v960_v11, %v730_v55  ;;  %v1068_v45 = vadd.f32 %v951_v27, %v717_v43 }
 0x1b3   :  { %v1060_v26 = vadd.f32 %v949_v58, %v868_v53  ;;  %v2949_v53 = vld [vmem:[#allocation10_spill] sm:$0xff]  ;;  %v1101_v34 = vmax.f32 %v1017_v50, 0.0  ;;  %v1194_v50 = vmax.f32 %v1193_v32, %v1155_v56 }
 0x1b4   :  { %v672_v46 = vadd.f32 %v2786_v14, %v2949_v53  ;;  %v1089_v10 = vmax.f32 %v1005_v38, 0.0  ;;  %v677_v14 = vadd.f32 %v2804_v12, %v2952_v57  ;;  %v2955_v38 = vld [vmem:[#allocation18_spill] sm:$0xff]  ;;  %v1167_v20 = vmax.f32 %v1083_v44, 0.0 }
 0x1b5   :  { %v1144_v28 = vmax.f32 %v1060_v26, 0.0  ;;  %v1146_v26 = vmax.f32 %v1062_v41, 0.0  ;;  %v2954_v41 = vld [vmem:[#allocation16_spill] sm:$0xff]  ;;  %v1152_v43 = vmax.f32 %v1068_v45, 0.0 }
 0x1b6   :  { %v1185_v25 = vmax.f32 %v1089_v10, %v1095_v47  ;;  %v1014_v24 = vadd.f32 %v924_v61, %v672_v46  ;;  %v1020_v27 = vadd.f32 %v927_v18, %v677_v14  ;;  %v2956_v61 = vld [vmem:[#allocation17_spill] sm:$0xff]  ;;  %v1080_v46 = vadd.f32 %v957_v59, %v727_v54 }
 0x1b7   :  { %v2842_v5 = vmax.f32 %v1205_v37, %v1144_v28  ;;  %v930_v37 = vperm.slane %v2502_v1, 1  ;;  %v667_v1 = vadd.f32 %v2773_v42, %v2950_v31  ;;  %v722_v28 = vadd.f32 %v2951_v30, %v2781_v2  ;;  %v652_v6 = vpop.f32.mrf.mxu2 }
 0x1b8   :  { %v2847_v48 = vpop.f32.mrf.mxu3  ;;  %v933_v42 = vperm.slane %v2529_v35, 1  ;;  %v1161_v2 = vmax.f32 %v1077_v33, 0.0  ;;  %v1186_v35 = vmax.f32 %v1185_v25, %v1101_v34  ;;  %v732_v55 = vadd.f32 %v2956_v61, %v652_v6 }
 0x1b9   :  { %v681_v63 = vpop.f32.mrf.mxu0  ;;  %v2851_v40 = vpop.f32.mrf.mxu1  ;;  %v1023_v23 = vadd.f32 %v930_v37, %v680_v13  ;;  %v1008_v9 = vadd.f32 %v921_v60, %v667_v1  ;;  %v1074_v62 = vadd.f32 %v954_v22, %v722_v28  ;;  %v1098_v47 = vmax.f32 %v1014_v24, 0.0  ;;  %v1943_v60 = vld [vmem:[%s2919_s3 + $0x90] sm:$0xff] }
 0x1ba   :  { %v682_v12 = vadd.f32 %v681_v63, %v2954_v41  ;;  %v1195_v53 = vmax.f32 %v1194_v50, %v1161_v2  ;;  %v1231_v63 = vmax.f32 %v2736_v51, %v1146_v26  ;;  %v1104_v22 = vmax.f32 %v1020_v27, 0.0  ;;  %1482 = vmatpush.bf16.msra.mxu0 %v1943_v60  ;;  %v2957_v51 = vld [vmem:[#allocation19_spill] sm:$0xff] }
 0x1bb   :  { %v1107_v7 = vmax.f32 %v1023_v23, 0.0  ;;  %v1092_v23 = vmax.f32 %v1008_v9, 0.0  ;;  %v1158_v31 = vmax.f32 %v1074_v62, 0.0  ;;  %v1086_v1 = vadd.f32 %v960_v11, %v732_v55  ;;  %v1942_v11 = vld [vmem:[%s2919_s3 + $0x88] sm:$0xff] }
 0x1bc   :  { %v1026_v3 = vadd.f32 %v930_v37, %v682_v12  ;;  %v1196_v18 = vmax.f32 %v1195_v53, %v1167_v20  ;;  %v1232_v28 = vmax.f32 %v1231_v63, %v1152_v43  ;;  %v1164_v37 = vmax.f32 %v1080_v46, 0.0 }
 0x1bd   :  { %v1187_v33 = vmax.f32 %v1186_v35, %v1107_v7  ;;  %v1224_v34 = vmax.f32 %v1092_v23, %v1098_v47  ;;  %v1170_v6 = vmax.f32 %v1086_v1, 0.0  ;;  %v870_v35 = vadd.f32 %v2847_v48, %v2820_v8 }
 0x1be   :  { %v1110_v32 = vmax.f32 %v1026_v3, 0.0  ;;  %v1233_v14 = vmax.f32 %v1232_v28, %v1158_v31  ;;  %1483 = vmatpush.bf16.msra.mxu0 %v1942_v11  ;;  %v952_v20 = vperm.slane %v2714_v16, 2  ;;  %v955_v47 = vperm.slane %v2725_v36, 2 }
 0x1bf   :  { %v1225_v44 = vmax.f32 %v1224_v34, %v1104_v22  ;;  %v1063_v55 = vadd.f32 %v949_v58, %v870_v35  ;;  %v958_v8 = vperm.slane %v2734_v17, 2 }
 0x1c0   :  { %v2873_v29 = vpop.f32.mrf.mxu3  ;;  %v1234_v25 = vmax.f32 %v1233_v14, %v1164_v37 }
 0x1c1   :  { %v684_v19 = vpop.f32.mrf.mxu0  ;;  %v2876_v4 = vpop.f32.mrf.mxu1  ;;  %v1226_v24 = vmax.f32 %v1225_v44, %v1110_v32  ;;  %v873_v27 = vadd.f32 %v2873_v29, %v2851_v40  ;;  %v1147_v40 = vmax.f32 %v1063_v55, 0.0 }
 0x1c2   :  { %v685_v13 = vadd.f32 %v684_v19, %v2955_v38  ;;  %v1235_v19 = vmax.f32 %v1234_v25, %v1170_v6 }
 0x1c3   :  { %v1066_v46 = vadd.f32 %v952_v20, %v873_v27  ;;  %v1245_v36 = vmax.f32 %v2817_v0, %v1147_v40 }
 0x1c4   :  { %v1029_v15 = vadd.f32 %v933_v42, %v685_v13 }
 0x1c5   :  { %v1150_v49 = vmax.f32 %v1066_v46, 0.0 }
 0x1c6   :  { %v1113_v10 = vmax.f32 %v1029_v15, 0.0 }
 0x1c7   :  { %v1207_v1 = vmax.f32 %v2842_v5, %v1150_v49  ;;  %v1953_v5 = vld [vmem:[%s2920_s4] ss:$0 sm:$0xff] }
 0x1c8   :  { %v1188_v56 = vmax.f32 %v1187_v33, %v1113_v10  ;;  %v874_v30 = vpop.f32.mrf.mxu3 }
 0x1c9   :  { %v686_v52 = vpop.f32.mrf.mxu0  ;;  %v798_v59 = vpop.f32.mrf.mxu1  ;;  %v875_v61 = vadd.f32 %v874_v30, %v2876_v4  ;;  %v961_v4 = vperm.slane %v2750_v21, 2 }
 0x1ca   :  { %v1197_v57 = vmax.f32 %v1196_v18, %v1188_v56  ;;  %v687_v26 = vadd.f32 %v686_v52, %v2957_v51 }
 0x1cb   :  { %v1069_v3 = vadd.f32 %v952_v20, %v875_v61 }
 0x1cc   :  { %v1032_v45 = vadd.f32 %v933_v42, %v687_v26  ;;  %v1941_v42 = vld [vmem:[%s2919_s3 + $0x80] sm:$0xff] }
 0x1cd   :  { %1484 = vmatpush.bf16.msra.mxu0 %v1941_v42  ;;  %v1153_v58 = vmax.f32 %v1069_v3, 0.0 }
 0x1ce   :  { %v1116_v2 = vmax.f32 %v1032_v45, 0.0 }
 0x1cf   :  { %v1246_v30 = vmax.f32 %v1245_v36, %v1153_v58 }
 0x1d0   :  { %v1227_v39 = vmax.f32 %v1226_v24, %v1116_v2  ;;  %v877_v54 = vpop.f32.mrf.mxu3 }
 0x1d1   :  { %v800_v7 = vpop.f32.mrf.mxu1  ;;  %v878_v43 = vadd.f32 %v877_v54, %v798_v59 }
 0x1d2   :  { %v1236_v41 = vmax.f32 %v1235_v19, %v1227_v39 }
 0x1d3   :  { %v1072_v29 = vadd.f32 %v955_v47, %v878_v43 }
 0x1d4   :  { %v1251_v12 = vpack.c.bf16 %v1236_v41, %v1197_v57 }
 0x1d5   :  { %v1156_v60 = vmax.f32 %v1072_v29, 0.0 }
 0x1d6   :  { %1471 = vmatmul.bf16.vlgmr.msrb.gmra.mxu2 %v1251_v12 }
 0x1d7   :  { %v1208_v59 = vmax.f32 %v1207_v1, %v1156_v60 }
 0x1d8   :  { %v879_v38 = vpop.f32.mrf.mxu3 }
 0x1d9   :  { %v803_v13 = vpop.f32.mrf.mxu1  ;;  %v880_v53 = vadd.f32 %v879_v38, %v800_v7 }
 0x1db   :  { %v1075_v16 = vadd.f32 %v955_v47, %v880_v53 }
 0x1dd   :  { %v1159_v22 = vmax.f32 %v1075_v16, 0.0 }
 0x1df   :  { %v1247_v37 = vmax.f32 %v1246_v30, %v1159_v22 }
 0x1e0   :  { %v882_v9 = vpop.f32.mrf.mxu3 }
 0x1e1   :  { %v805_v50 = vpop.f32.mrf.mxu1  ;;  %v883_v10 = vadd.f32 %v882_v9, %v803_v13 }
 0x1e3   :  { %v1078_v23 = vadd.f32 %v958_v8, %v883_v10 }
 0x1e5   :  { %v1162_v28 = vmax.f32 %v1078_v23, 0.0 }
 0x1e7   :  { %v1209_v57 = vmax.f32 %v1208_v59, %v1162_v28 }
 0x1e8   :  { %v884_v62 = vpop.f32.mrf.mxu3 }
 0x1e9   :  { %v808_v15 = vpop.f32.mrf.mxu1  ;;  %v885_v48 = vadd.f32 %v884_v62, %v805_v50 }
 0x1eb   :  { %v1081_v31 = vadd.f32 %v958_v8, %v885_v48 }
 0x1ed   :  { %v1165_v34 = vmax.f32 %v1081_v31, 0.0 }
 0x1ef   :  { %v1248_v51 = vmax.f32 %v1247_v37, %v1165_v34 }
 0x1f0   :  { %v887_v33 = vpop.f32.mrf.mxu3 }
 0x1f1   :  { %v888_v63 = vadd.f32 %v887_v33, %v808_v15  ;;  %v810_v56 = vpop.f32.mrf.mxu1 }
 0x1f3   :  { %v1084_v18 = vadd.f32 %v961_v4, %v888_v63 }
 0x1f5   :  { %v1168_v21 = vmax.f32 %v1084_v18, 0.0 }
 0x1f7   :  { %v1210_v14 = vmax.f32 %v1209_v57, %v1168_v21 }
 0x1f8   :  { %v889_v17 = vpop.f32.mrf.mxu3 }
 0x1f9   :  { %v890_v52 = vadd.f32 %v889_v17, %v810_v56 }
 0x1fb   :  { %v1087_v32 = vadd.f32 %v961_v4, %v890_v52 }
 0x1fd   :  { %v1171_v26 = vmax.f32 %v1087_v32, 0.0 }
 0x1ff   :  { %v1249_v0 = vmax.f32 %v1248_v51, %v1171_v26 }
 0x201   :  { %v1252_v44 = vpack.c.bf16 %v1249_v0, %v1210_v14 }
 0x203   :  { %1485 = vmatmul.bf16.vlgmr.msra.gmra.mxu0 %v1252_v44 }
 0x207   :  { %v1458_v6 = vpop.f32.mrf.mxu2 }
 0x208   :  { %v1459_v24 = vadd.f32 %v1953_v5, %v1458_v6 }
 0x20f   :  { %v1460_v45 = vpop.f32.mrf.mxu2 }
 0x210   :  { %v1461_v54 = vadd.f32 %v1953_v5, %v1460_v45 }
 0x259   :  { %v1472_v25 = vpop.f32.mrf.mxu2 }
 0x25a   :  { %v1473_v2 = vadd.f32 %v1472_v25, %v1459_v24 }
 0x261   :  { %v1474_v39 = vpop.f32.mrf.mxu2 }
 0x262   :  { %v1475_v7 = vadd.f32 %v1474_v39, %v1461_v54 }
 0x280   :  { %v1486_v11 = vpop.f32.mrf.mxu0 }
 0x281   :  { %v1487_v19 = vadd.f32 %v1486_v11, %v1473_v2 }
 0x283   :  { %1491 = vst [vmem:[%s2921_s5] sm:$0xff] %v1487_v19 }
 0x288   :  { %v1488_v41 = vpop.f32.mrf.mxu0 }
 0x289   :  { %v1489_v12 = vadd.f32 %v1488_v41, %v1475_v7 }
 0x28b   :  { %1492 = vst [vmem:[%s2921_s5 + $0x8] sm:$0xff] %v1489_v12 }

</bundles_post_ra>
